<compile_context>
chip_gen: v5e
topology: v5e:2x2
jax: 0.10.0
libtpu: 0.0.40
codegen_flags: <defaults>
</compile_context>

<pallas_src>
import functools

import numpy as np

import jax
import jax.numpy as jnp
from jax.experimental import pallas as pl
from jax.experimental.pallas import tpu as pltpu

TARGET_BLOCK_BYTES = 2 * 1024 * 1024   # ~2 MiB blocks: amortize ~0.35us/step overhead,
                                       # keep double-buffered in+out << v7x VMEM budget.
MAX_ROWS = 256                         # sublane rows per block (= n_qubits * G)
MIN_LANES = 128                        # keep lane dim >= one vreg row when possible


# --------------------------------------------------------------------------- kernel
def _quanv_kernel(coef_ref, x_ref, o_ref, *, n_qubits, groups):
    """coef_ref : SMEM (n_qubits, 2) -> [R_q, phi_q]
       x_ref    : VMEM (TB, n_qubits*groups, T); row q*groups+g = qubit q, patch group g
       o_ref    : VMEM (TB, n_qubits*groups, T); row c*groups+g = channel c, group g"""
    g = groups
    z = []
    for q in range(n_qubits):
        r_q = coef_ref[q, 0]
        phi_q = coef_ref[q, 1]
        xq = x_ref[:, q * g:(q + 1) * g, :]
        # z_q = A cos(pi x) + B sin(pi x) = R cos(pi x - phi): one cos per element
        z.append(r_q * jnp.cos(jnp.pi * xq - phi_q))

    # channel i >= 1: z_0 * ... * z_i  (prefix products, stored directly, no concat)
    prefix = z[0] * z[1]
    o_ref[:, g:2 * g, :] = prefix
    for i in range(2, n_qubits):
        prefix = prefix * z[i]
        o_ref[:, i * g:(i + 1) * g, :] = prefix
    # channel 0: z_1 * ... * z_{n-1}
    tail = z[1]
    for q in range(2, n_qubits):
        tail = tail * z[q]
    o_ref[:, 0:g, :] = tail


# ------------------------------------------------------------------- tiling helpers
def _divisors_up_to(n, limit):
    return [d for d in range(1, min(n, limit) + 1) if n % d == 0]


def _choose_groups(hw, n_qubits):
    """Patch groups per qubit: G | hw, prefer 8 | G (aligned channel row slices),
    rows = n_qubits*G <= MAX_ROWS, and keep the lane dim hw // G >= MIN_LANES."""
    limit = max(1, MAX_ROWS // n_qubits)
    cands = [d for d in _divisors_up_to(hw, limit) if hw // d >= MIN_LANES]
    aligned = [d for d in cands if d % 8 == 0]
    if aligned:
        return max(aligned)
    ok = [d for d in cands if (d * n_qubits) % 8 == 0]
    if ok:
        return max(ok)
    return 1


def _choose_tiles(batch, rows, s):
    """Batch tile TB | batch and lane tile T | S so one block is ~TARGET_BLOCK_BYTES.
    Tiny problems stay a single grid step (no forced split on single-TC chips);
    large problems naturally produce many ~2 MiB blocks (megacore-friendly)."""
    per_image = rows * s * 4
    if per_image <= TARGET_BLOCK_BYTES:
        tb = max(d for d in _divisors_up_to(batch, batch)
                 if d * per_image <= TARGET_BLOCK_BYTES)
        return tb, s
    t = s
    if s % 128 == 0:
        mults = [m for m in range(128, s + 1, 128)
                 if s % m == 0 and rows * m * 4 <= TARGET_BLOCK_BYTES]
        t = max(mults) if mults else 128
    return 1, t


# ------------------------------------------------------------------------- wrapper
def _quan_conv2d(x, weight, *, n_qubits, stride, kernel_size, w_mul):
    """x: (B, C, H, W) NCHW; only channel 0 is used, as in the torch module."""
    if n_qubits != kernel_size ** 2:
        raise ValueError("number of qubits must == kernel_size**2")
    if n_qubits < 2:
        raise ValueError("kernel requires n_qubits >= 2")

    batch, _, h, w_in = x.shape
    k = kernel_size
    h_out = (h - k) // stride + 1
    w_out = (w_in - k) // stride + 1
    hw = h_out * w_out

    # ---- per-qubit coefficients (R, phi): 2*n_qubits scalars, live in SMEM --------
    wq = weight.reshape(n_qubits, 3).astype(jnp.float32) * w_mul
    a, b, c = wq[:, 0], wq[:, 1], wq[:, 2]
    amp_a = jnp.cos(a) * jnp.cos(c) - jnp.sin(a) * jnp.cos(b) * jnp.sin(c)
    amp_b = jnp.sin(b) * jnp.sin(c)
    coef = jnp.stack([jnp.sqrt(amp_a * amp_a + amp_b * amp_b),
                      jnp.arctan2(amp_b, amp_a)], axis=1)          # (n_qubits, 2)

    # ---- qubit-major patch layout: ONE fused transpose pass; everything else below
    #      (group / row packing and the post-kernel unpacking) is a free reshape ----
    x0 = x[:, 0].astype(jnp.float32)                               # (B, H, W)
    if stride == k:
        xp = x0[:, :h_out * k, :w_out * k].reshape(batch, h_out, k, w_out, k)
        xq = xp.transpose(0, 2, 4, 1, 3).reshape(batch, n_qubits, hw)
    else:
        # gather-free patch extraction for stride != kernel_size
        patches = jax.lax.conv_general_dilated_patches(
            x0[:, None, :, :], filter_shape=(k, k),
            window_strides=(stride, stride), padding="VALID")      # (B, k*k, Hout, Wout)
        xq = patches.reshape(batch, n_qubits, hw)

    groups = _choose_groups(hw, n_qubits)
    rows = n_qubits * groups
    s = hw // groups
    xg = xq.reshape(batch, n_qubits, groups, s).reshape(batch, rows, s)  # free

    tb, t = _choose_tiles(batch, rows, s)
    grid = (batch // tb, s // t)

    block_bytes = tb * rows * t * 4
    compiler_kwargs = dict(dimension_semantics=("parallel", "parallel"))
    vmem_need = 4 * block_bytes + (2 << 20)     # in + out, double buffered, + slack
    if vmem_need > 30 * 1024 * 1024:
        compiler_kwargs["vmem_limit_bytes"] = int(min(vmem_need, 64 * 1024 * 1024))

    kern = functools.partial(_quanv_kernel, n_qubits=n_qubits, groups=groups)
    out = pl.pallas_call(
        kern,
        out_shape=jax.ShapeDtypeStruct((batch, rows, s), jnp.float32),
        grid=grid,
        in_specs=[
            pl.BlockSpec(memory_space=pltpu.MemorySpace.SMEM),       # (n_qubits, 2) scalars
            pl.BlockSpec((tb, rows, t), lambda i, j: (i, 0, j)),     # packed patch tile
        ],
        out_specs=pl.BlockSpec((tb, rows, t), lambda i, j: (i, 0, j)),
        compiler_params=pltpu.CompilerParams(**compiler_kwargs),
    )(coef, xg)

    # free reshapes back to NCHW: row c*groups + g  ->  channel c, patch g*s + s_idx
    out = out.reshape(batch, n_qubits, groups, s).reshape(batch, n_qubits, hw)
    return out.reshape(batch, n_qubits, h_out, w_out)


quan_conv2d = jax.jit(
    _quan_conv2d, static_argnames=("n_qubits", "stride", "kernel_size", "w_mul"))


# ---------------------------------------------------------------------- references
def quan_conv2d_ref(x, weight, *, n_qubits, stride, kernel_size, w_mul):
    """Closed-form pure-JAX reference (no Pallas) for layout validation."""
    batch, _, h, w_in = x.shape
    k = kernel_size
    h_out = (h - k) // stride + 1
    w_out = (w_in - k) // stride + 1
    x0 = x[:, 0].astype(jnp.float32)
    i_idx = (jnp.arange(h_out) * stride)[:, None] + jnp.arange(k)[None, :]
    j_idx = (jnp.arange(w_out) * stride)[:, None] + jnp.arange(k)[None, :]
    patches = x0[:, i_idx[:, :, None, None], j_idx[None, None, :, :]]  # (B,Hout,k,Wout,k)
    patches = patches.transpose(0, 1, 3, 2, 4).reshape(batch, h_out, w_out, n_qubits)
    wq = weight.reshape(n_qubits, 3).astype(jnp.float32) * w_mul
    amp_a = (jnp.cos(wq[:, 0]) * jnp.cos(wq[:, 2])
             - jnp.sin(wq[:, 0]) * jnp.cos(wq[:, 1]) * jnp.sin(wq[:, 2]))
    amp_b = jnp.sin(wq[:, 1]) * jnp.sin(wq[:, 2])
    z = amp_a * jnp.cos(jnp.pi * patches) + amp_b * jnp.sin(jnp.pi * patches)
    pref = jnp.cumprod(z, axis=-1)
    ch0 = jnp.prod(z[..., 1:], axis=-1, keepdims=True)
    out = jnp.concatenate([ch0, pref[..., 1:]], axis=-1)
    return out.transpose(0, 3, 1, 2)


def quan_conv2d_exact_ref(x, weight, *, n_qubits, stride, kernel_size, w_mul):
    """Brute-force 2^n density-matrix simulation of the original circuit (numpy)."""
    x = np.asarray(x, dtype=np.float64)
    w = np.asarray(weight, dtype=np.float64).reshape(n_qubits, 3) * w_mul
    n, k = n_qubits, kernel_size
    I2 = np.eye(2, dtype=complex)
    X = np.array([[0, 1], [1, 0]], dtype=complex)
    Y = np.array([[0, -1j], [1j, 0]], dtype=complex)
    Z = np.array([[1, 0], [0, -1]], dtype=complex)
    P0 = np.array([[1, 0], [0, 0]], dtype=complex)
    P1 = np.array([[0, 0], [0, 1]], dtype=complex)
    rx = lambda t: np.cos(t / 2) * I2 - 1j * np.sin(t / 2) * X
    rz = lambda t: np.cos(t / 2) * I2 - 1j * np.sin(t / 2) * Z

    def kron_all(ops):
        out = np.array([[1.0 + 0j]])
        for o in ops:
            out = np.kron(out, o)
        return out

    def cnot(ctl, tgt):
        a = kron_all([P0 if i == ctl else I2 for i in range(n)])
        b = kron_all([P1 if i == ctl else (X if i == tgt else I2) for i in range(n)])
        return a + b

    u2 = kron_all([rx(w[q, 2]) @ rz(w[q, 1]) @ rx(w[q, 0]) for q in range(n)])
    for q in range(n):
        u2 = cnot(q, (q + 1) % n) @ u2
    meas = [u2.conj().T @ kron_all([Z if i == q else I2 for i in range(n)]) @ u2
            for q in range(n)]

    batch = x.shape[0]
    h_out = (x.shape[2] - k) // stride + 1
    w_out = (x.shape[3] - k) // stride + 1
    out = np.zeros((batch, n, h_out, w_out))
    for bi in range(batch):
        for ho in range(h_out):
            for wo in range(w_out):
                patch = x[bi, 0, ho * stride:ho * stride + k,
                          wo * stride:wo * stride + k].reshape(-1)
                psi = np.array([1.0 + 0j])
                for q in range(n):
                    th = np.pi * patch[q]
                    psi = np.kron(psi, np.array([np.cos(th / 2), np.sin(th / 2)],
                                                dtype=complex))
                for ch in range(n):
                    out[bi, ch, ho, wo] = np.real(psi.conj() @ (meas[ch] @ psi))
    return out


# ------------------------------------------------------------------------------ main
if __name__ == "__main__":
    # Module hyperparameters (n_qubits must equal kernel_size ** 2).
    n_qubits, kernel_size, stride = 4, 2, 2
    gain, use_wscale, lrmul = 2 ** 0.5, True, 1.0
    he_std = gain * 5 ** (-0.5)
    init_std = 1.0 / lrmul if use_wscale else he_std / lrmul
    w_mul = he_std * lrmul if use_wscale else lrmul

    key = jax.random.PRNGKey(0)
    kw, kx, kx2 = jax.random.split(key, 3)
    weight = jax.random.uniform(
        kw, (n_qubits * 3,), minval=0.0, maxval=2.0 * jnp.pi, dtype=jnp.float32
    ) * init_std

    # Case 1: small NCHW input matching the module's expectations (non-overlapping).
    x = jax.random.uniform(kx, (2, 4, 16, 16), dtype=jnp.float32)
    out = jax.block_until_ready(
        quan_conv2d(x, weight, n_qubits=n_qubits, stride=stride,
                    kernel_size=kernel_size, w_mul=w_mul))
    assert out.shape == (2, n_qubits, 8, 8) and out.dtype == jnp.float32
    ref = quan_conv2d_ref(x, weight, n_qubits=n_qubits, stride=stride,
                          kernel_size=kernel_size, w_mul=w_mul)
    assert jnp.allclose(out, ref, atol=1e-5, rtol=1e-5), "mismatch vs closed-form ref"
    exact = quan_conv2d_exact_ref(np.asarray(x), np.asarray(weight),
                                  n_qubits=n_qubits, stride=stride,
                                  kernel_size=kernel_size, w_mul=w_mul)
    assert np.allclose(np.asarray(out), exact, atol=1e-4), \
        "mismatch vs exact density-matrix simulation"

    # Case 2: larger image -> exercises the packed (G>1, 8-aligned row slices) path.
    x2 = jax.random.uniform(kx2, (2, 1, 64, 128), dtype=jnp.float32)
    out2 = jax.block_until_ready(
        quan_conv2d(x2, weight, n_qubits=n_qubits, stride=stride,
                    kernel_size=kernel_size, w_mul=w_mul))
    ref2 = quan_conv2d_ref(x2, weight, n_qubits=n_qubits, stride=stride,
                           kernel_size=kernel_size, w_mul=w_mul)
    assert jnp.allclose(out2, ref2, atol=1e-5, rtol=1e-5), "mismatch (packed path)"

    # Case 3: stride != kernel_size -> gather-free conv_general_dilated_patches path.
    x3 = jax.random.uniform(jax.random.PRNGKey(3), (2, 2, 14, 14), dtype=jnp.float32)
    out3 = jax.block_until_ready(
        quan_conv2d(x3, weight, n_qubits=n_qubits, stride=3,
                    kernel_size=kernel_size, w_mul=w_mul))
    ref3 = quan_conv2d_ref(x3, weight, n_qubits=n_qubits, stride=3,
                           kernel_size=kernel_size, w_mul=w_mul)
    assert jnp.allclose(out3, ref3, atol=1e-5, rtol=1e-5), "mismatch (stride != k path)"

    print("KERNEL_OK")
</pallas_src>

<mosaic_0001>
module attributes {stable_mosaic.version = 11 : i64} {
  func.func @_quanv_kernel(%arg0: i32, %arg1: i32, %arg2: memref<4x2xf32, #tpu.memory_space<smem>>, %arg3: memref<2x4x64xf32, #tpu.memory_space<vmem>>, %arg4: memref<2x4x64xf32, #tpu.memory_space<vmem>>) attributes {dimension_semantics = [#tpu.dimension_semantics<parallel>, #tpu.dimension_semantics<parallel>], iteration_bounds = array<i64: 1, 1>, scalar_prefetch = 0 : i64, scratch_operands = 0 : i64, tpu.core_type = #tpu.core_type<tc>, window_params = [{transform_indices = @transform_0, window_bounds = array<i64: 4, 2>}, {transform_indices = @transform_1, window_bounds = array<i64: 2, 4, 64>}, {transform_indices = @transform_2, window_bounds = array<i64: 2, 4, 64>}]} {
    %c0 = arith.constant 0 : index
    %c0_0 = arith.constant 0 : index
    %0 = memref.load %arg2[%c0, %c0_0] : memref<4x2xf32, #tpu.memory_space<smem>>
    %c0_1 = arith.constant 0 : index
    %c1 = arith.constant 1 : index
    %1 = memref.load %arg2[%c0_1, %c1] : memref<4x2xf32, #tpu.memory_space<smem>>
    %c0_2 = arith.constant 0 : index
    %c0_3 = arith.constant 0 : index
    %c0_4 = arith.constant 0 : index
    %2 = vector.load %arg3[%c0_2, %c0_3, %c0_4] : memref<2x4x64xf32, #tpu.memory_space<vmem>>, vector<2x1x64xf32>
    %cst = arith.constant 3.14159274 : f32
    %3 = vector.broadcast %cst : f32 to vector<2x1x64xf32>
    %4 = arith.mulf %3, %2 : vector<2x1x64xf32>
    %5 = vector.broadcast %1 : f32 to vector<2x1x64xf32>
    %6 = arith.subf %4, %5 : vector<2x1x64xf32>
    %7 = math.cos %6 : vector<2x1x64xf32>
    %8 = vector.broadcast %0 : f32 to vector<2x1x64xf32>
    %9 = arith.mulf %8, %7 : vector<2x1x64xf32>
    %c1_5 = arith.constant 1 : index
    %c0_6 = arith.constant 0 : index
    %10 = memref.load %arg2[%c1_5, %c0_6] : memref<4x2xf32, #tpu.memory_space<smem>>
    %c1_7 = arith.constant 1 : index
    %c1_8 = arith.constant 1 : index
    %11 = memref.load %arg2[%c1_7, %c1_8] : memref<4x2xf32, #tpu.memory_space<smem>>
    %c0_9 = arith.constant 0 : index
    %c1_10 = arith.constant 1 : index
    %c0_11 = arith.constant 0 : index
    %12 = vector.load %arg3[%c0_9, %c1_10, %c0_11] : memref<2x4x64xf32, #tpu.memory_space<vmem>>, vector<2x1x64xf32>
    %cst_12 = arith.constant 3.14159274 : f32
    %13 = vector.broadcast %cst_12 : f32 to vector<2x1x64xf32>
    %14 = arith.mulf %13, %12 : vector<2x1x64xf32>
    %15 = vector.broadcast %11 : f32 to vector<2x1x64xf32>
    %16 = arith.subf %14, %15 : vector<2x1x64xf32>
    %17 = math.cos %16 : vector<2x1x64xf32>
    %18 = vector.broadcast %10 : f32 to vector<2x1x64xf32>
    %19 = arith.mulf %18, %17 : vector<2x1x64xf32>
    %c2 = arith.constant 2 : index
    %c0_13 = arith.constant 0 : index
    %20 = memref.load %arg2[%c2, %c0_13] : memref<4x2xf32, #tpu.memory_space<smem>>
    %c2_14 = arith.constant 2 : index
    %c1_15 = arith.constant 1 : index
    %21 = memref.load %arg2[%c2_14, %c1_15] : memref<4x2xf32, #tpu.memory_space<smem>>
    %c0_16 = arith.constant 0 : index
    %c2_17 = arith.constant 2 : index
    %c0_18 = arith.constant 0 : index
    %22 = vector.load %arg3[%c0_16, %c2_17, %c0_18] : memref<2x4x64xf32, #tpu.memory_space<vmem>>, vector<2x1x64xf32>
    %cst_19 = arith.constant 3.14159274 : f32
    %23 = vector.broadcast %cst_19 : f32 to vector<2x1x64xf32>
    %24 = arith.mulf %23, %22 : vector<2x1x64xf32>
    %25 = vector.broadcast %21 : f32 to vector<2x1x64xf32>
    %26 = arith.subf %24, %25 : vector<2x1x64xf32>
    %27 = math.cos %26 : vector<2x1x64xf32>
    %28 = vector.broadcast %20 : f32 to vector<2x1x64xf32>
    %29 = arith.mulf %28, %27 : vector<2x1x64xf32>
    %c3 = arith.constant 3 : index
    %c0_20 = arith.constant 0 : index
    %30 = memref.load %arg2[%c3, %c0_20] : memref<4x2xf32, #tpu.memory_space<smem>>
    %c3_21 = arith.constant 3 : index
    %c1_22 = arith.constant 1 : index
    %31 = memref.load %arg2[%c3_21, %c1_22] : memref<4x2xf32, #tpu.memory_space<smem>>
    %c0_23 = arith.constant 0 : index
    %c3_24 = arith.constant 3 : index
    %c0_25 = arith.constant 0 : index
    %32 = vector.load %arg3[%c0_23, %c3_24, %c0_25] : memref<2x4x64xf32, #tpu.memory_space<vmem>>, vector<2x1x64xf32>
    %cst_26 = arith.constant 3.14159274 : f32
    %33 = vector.broadcast %cst_26 : f32 to vector<2x1x64xf32>
    %34 = arith.mulf %33, %32 : vector<2x1x64xf32>
    %35 = vector.broadcast %31 : f32 to vector<2x1x64xf32>
    %36 = arith.subf %34, %35 : vector<2x1x64xf32>
    %37 = math.cos %36 : vector<2x1x64xf32>
    %38 = vector.broadcast %30 : f32 to vector<2x1x64xf32>
    %39 = arith.mulf %38, %37 : vector<2x1x64xf32>
    %40 = arith.mulf %9, %19 : vector<2x1x64xf32>
    %c0_27 = arith.constant 0 : index
    %c1_28 = arith.constant 1 : index
    %c0_29 = arith.constant 0 : index
    %41 = vector.load %arg4[%c0_27, %c1_28, %c0_29] : memref<2x4x64xf32, #tpu.memory_space<vmem>>, vector<2x1x64xf32>
    tpu.vector_store %arg4[%c0_27, %c1_28, %c0_29], %40 {strides = array<i32>} : memref<2x4x64xf32, #tpu.memory_space<vmem>>, vector<2x1x64xf32>,
    %42 = arith.mulf %40, %29 : vector<2x1x64xf32>
    %c0_30 = arith.constant 0 : index
    %c2_31 = arith.constant 2 : index
    %c0_32 = arith.constant 0 : index
    %43 = vector.load %arg4[%c0_30, %c2_31, %c0_32] : memref<2x4x64xf32, #tpu.memory_space<vmem>>, vector<2x1x64xf32>
    tpu.vector_store %arg4[%c0_30, %c2_31, %c0_32], %42 {strides = array<i32>} : memref<2x4x64xf32, #tpu.memory_space<vmem>>, vector<2x1x64xf32>,
    %44 = arith.mulf %42, %39 : vector<2x1x64xf32>
    %c0_33 = arith.constant 0 : index
    %c3_34 = arith.constant 3 : index
    %c0_35 = arith.constant 0 : index
    %45 = vector.load %arg4[%c0_33, %c3_34, %c0_35] : memref<2x4x64xf32, #tpu.memory_space<vmem>>, vector<2x1x64xf32>
    tpu.vector_store %arg4[%c0_33, %c3_34, %c0_35], %44 {strides = array<i32>} : memref<2x4x64xf32, #tpu.memory_space<vmem>>, vector<2x1x64xf32>,
    %46 = arith.mulf %19, %29 : vector<2x1x64xf32>
    %47 = arith.mulf %46, %39 : vector<2x1x64xf32>
    %c0_36 = arith.constant 0 : index
    %c0_37 = arith.constant 0 : index
    %c0_38 = arith.constant 0 : index
    %48 = vector.load %arg4[%c0_36, %c0_37, %c0_38] : memref<2x4x64xf32, #tpu.memory_space<vmem>>, vector<2x1x64xf32>
    tpu.vector_store %arg4[%c0_36, %c0_37, %c0_38], %47 {strides = array<i32>} : memref<2x4x64xf32, #tpu.memory_space<vmem>>, vector<2x1x64xf32>,
    return
  }
  func.func @transform_0(%arg0: i32, %arg1: i32) -> (i32, i32) {
    %c0_i32 = arith.constant 0 : i32
    %c0_i32_0 = arith.constant 0 : i32
    %c0_i32_1 = arith.constant 0 : i32
    return %c0_i32, %c0_i32_0 : i32, i32
  }
  func.func @transform_1(%arg0: i32, %arg1: i32) -> (i32, i32, i32) {
    %c0_i32 = arith.constant 0 : i32
    %c0_i32_0 = arith.constant 0 : i32
    return %arg0, %c0_i32, %arg1 : i32, i32, i32
  }
  func.func @transform_2(%arg0: i32, %arg1: i32) -> (i32, i32, i32) {
    %c0_i32 = arith.constant 0 : i32
    %c0_i32_0 = arith.constant 0 : i32
    return %arg0, %c0_i32, %arg1 : i32, i32, i32
  }
}

</mosaic_0001>

<bundles_post_ra>
// kernel: squeeze.7
= control target key start
LH: loop header
LB: loop body
LE: loop exit
PB: predicated region body
PF: predicated region fallthrough
CT: control target
= control target key end

     0   :  { %s365_s10 = smov 126   ;;  %s366_s11 = smov 124   ;;  %vm3_vm0 = vcmask 15360   ;;  %s650_s0 = inlined_call_operand.vmem [shape: f32[2,1,16,16], index: 0, kind: input, shape index: {}]   ;;  %s651_s1 = inlined_call_operand.vmem [shape: f32[2,8,2,8,2], index: 1, kind: output, shape index: {}]  }
   0x1   :  { %v27_v0 = vld [vmem:[%s650_s0] sm:$0xff]   ;;  %v286_v1 = vld [vmem:[%s650_s0 + $0x10] sm:$0xff]   ;;  %v283_v2 = vld [vmem:[%s650_s0 + $0x8] sm:$0xff]   ;;  %s368_s16 = smov 120   ;;  %s369_s17 = smov 118  }
   0x2   :  { %28 = vrot.lane.b32.xlu0 %v27_v0, %s365_s10  ;;  %46 = vrot.lane.b32.xlu1 %v286_v1, %s365_s10  ;;  %v289_v3 = vld [vmem:[%s650_s0 + $0x18] sm:$0xff]   ;;  %s367_s0 = smov 122   ;;  %4 = vst.msk [vmem:[%s651_s1] ss:$8 sm:$0xf] %vm3_vm0, %v27_v0   ;;  %s370_s5 = smov 116  }
   0x3   :  { %63 = vrot.lane.b32.xlu2 %v27_v0, %s366_s11  ;;  %5 = vst.msk [vmem:[%s651_s1] ss:$8 sm:$0xf0] %vm3_vm0, %v27_v0   ;;  %s371_s6 = smov 114  }
   0x4   :  { %273 = vst.msk [vmem:[%s651_s1 + $0x40] ss:$8 sm:$0xf] %vm3_vm0, %v283_v2  }
   0x5   :  { %274 = vst.msk [vmem:[%s651_s1 + $0x40] ss:$8 sm:$0xf0] %vm3_vm0, %v283_v2  }
   0x6   :  { %276 = vst.msk [vmem:[%s651_s1 + $0x80] ss:$8 sm:$0xf] %vm3_vm0, %v286_v1  }
   0x7   :  { %277 = vst.msk [vmem:[%s651_s1 + $0x80] ss:$8 sm:$0xf0] %vm3_vm0, %v286_v1  }
   0x8   :  { %279 = vst.msk [vmem:[%s651_s1 + $0xc0] ss:$8 sm:$0xf] %vm3_vm0, %v289_v3  }
   0x9   :  { %280 = vst.msk [vmem:[%s651_s1 + $0xc0] ss:$8 sm:$0xf0] %vm3_vm0, %v289_v3  }
   0xa   :  { %37 = vrot.lane.b32.xlu0 %v283_v2, %s365_s10  ;;  %55 = vrot.lane.b32.xlu1 %v289_v3, %s365_s10 }
   0xb   :  { %72 = vrot.lane.b32.xlu2 %v283_v2, %s366_s11 }
  0x12   :  { %81 = vrot.lane.b32.xlu0 %v286_v1, %s366_s11  ;;  %90 = vrot.lane.b32.xlu1 %v289_v3, %s366_s11 }
  0x13   :  { %98 = vrot.lane.b32.xlu2 %v27_v0, %s367_s0 }
  0x1a   :  { %107 = vrot.lane.b32.xlu0 %v283_v2, %s367_s0  ;;  %116 = vrot.lane.b32.xlu1 %v286_v1, %s367_s0 }
  0x1b   :  { %125 = vrot.lane.b32.xlu2 %v289_v3, %s367_s0 }
  0x22   :  { %133 = vrot.lane.b32.xlu0 %v27_v0, %s368_s16  ;;  %142 = vrot.lane.b32.xlu1 %v283_v2, %s368_s16 }
  0x23   :  { %151 = vrot.lane.b32.xlu2 %v286_v1, %s368_s16 }
  0x2a   :  { %160 = vrot.lane.b32.xlu0 %v289_v3, %s368_s16  ;;  %168 = vrot.lane.b32.xlu1 %v27_v0, %s369_s17 }
  0x2b   :  { %177 = vrot.lane.b32.xlu2 %v283_v2, %s369_s17 }
  0x32   :  { %186 = vrot.lane.b32.xlu0 %v286_v1, %s369_s17  ;;  %195 = vrot.lane.b32.xlu1 %v289_v3, %s369_s17 }
  0x33   :  { %203 = vrot.lane.b32.xlu2 %v27_v0, %s370_s5 }
  0x3a   :  { %212 = vrot.lane.b32.xlu0 %v283_v2, %s370_s5  ;;  %221 = vrot.lane.b32.xlu1 %v286_v1, %s370_s5 }
  0x3b   :  { %230 = vrot.lane.b32.xlu2 %v289_v3, %s370_s5 }
  0x42   :  { %238 = vrot.lane.b32.xlu0 %v27_v0, %s371_s6  ;;  %247 = vrot.lane.b32.xlu1 %v283_v2, %s371_s6 }
  0x43   :  { %256 = vrot.lane.b32.xlu2 %v286_v1, %s371_s6 }
  0x4a   :  { %265 = vrot.lane.b32.xlu0 %v289_v3, %s371_s6 }
  0x5d   :  { %v64_v4 = vpop.permute.xlu2 %63  }
  0x5e   :  { %292 = vst.msk [vmem:[%s651_s1 + $0x2] ss:$8 sm:$0xf] %vm3_vm0, %v64_v4  }
  0x5f   :  { %293 = vst.msk [vmem:[%s651_s1 + $0x2] ss:$8 sm:$0xf0] %vm3_vm0, %v64_v4  }
  0x65   :  { %v73_v5 = vpop.permute.xlu2 %72  }
  0x66   :  { %295 = vst.msk [vmem:[%s651_s1 + $0x42] ss:$8 sm:$0xf] %vm3_vm0, %v73_v5  }
  0x67   :  { %296 = vst.msk [vmem:[%s651_s1 + $0x42] ss:$8 sm:$0xf0] %vm3_vm0, %v73_v5  }
  0x6d   :  { %v99_v6 = vpop.permute.xlu2 %98  }
  0x6e   :  { %303 = vst.msk [vmem:[%s651_s1 + $0x3] ss:$8 sm:$0xf] %vm3_vm0, %v99_v6  }
  0x6f   :  { %304 = vst.msk [vmem:[%s651_s1 + $0x3] ss:$8 sm:$0xf0] %vm3_vm0, %v99_v6  }
  0x74   :  { %v29_v7 = vpop.permute.xlu0 %28   ;;  %v47_v8 = vpop.permute.xlu1 %46  }
  0x75   :  { %281 = vst.msk [vmem:[%s651_s1 + $0x1] ss:$8 sm:$0xf] %vm3_vm0, %v29_v7   ;;  %v126_v9 = vpop.permute.xlu2 %125  }
  0x76   :  { %282 = vst.msk [vmem:[%s651_s1 + $0x1] ss:$8 sm:$0xf0] %vm3_vm0, %v29_v7  }
  0x77   :  { %287 = vst.msk [vmem:[%s651_s1 + $0x81] ss:$8 sm:$0xf] %vm3_vm0, %v47_v8  }
  0x78   :  { %288 = vst.msk [vmem:[%s651_s1 + $0x81] ss:$8 sm:$0xf0] %vm3_vm0, %v47_v8  }
  0x79   :  { %312 = vst.msk [vmem:[%s651_s1 + $0xc3] ss:$8 sm:$0xf] %vm3_vm0, %v126_v9  }
  0x7a   :  { %313 = vst.msk [vmem:[%s651_s1 + $0xc3] ss:$8 sm:$0xf0] %vm3_vm0, %v126_v9  }
  0x7c   :  { %v38_v10 = vpop.permute.xlu0 %37   ;;  %v56_v11 = vpop.permute.xlu1 %55  }
  0x7d   :  { %284 = vst.msk [vmem:[%s651_s1 + $0x41] ss:$8 sm:$0xf] %vm3_vm0, %v38_v10   ;;  %v152_v12 = vpop.permute.xlu2 %151  }
  0x7e   :  { %285 = vst.msk [vmem:[%s651_s1 + $0x41] ss:$8 sm:$0xf0] %vm3_vm0, %v38_v10  }
  0x7f   :  { %290 = vst.msk [vmem:[%s651_s1 + $0xc1] ss:$8 sm:$0xf] %vm3_vm0, %v56_v11  }
  0x80   :  { %291 = vst.msk [vmem:[%s651_s1 + $0xc1] ss:$8 sm:$0xf0] %vm3_vm0, %v56_v11  }
  0x81   :  { %320 = vst.msk [vmem:[%s651_s1 + $0x84] ss:$8 sm:$0xf] %vm3_vm0, %v152_v12  }
  0x82   :  { %321 = vst.msk [vmem:[%s651_s1 + $0x84] ss:$8 sm:$0xf0] %vm3_vm0, %v152_v12  }
  0x84   :  { %v82_v13 = vpop.permute.xlu0 %81   ;;  %v91_v14 = vpop.permute.xlu1 %90  }
  0x85   :  { %298 = vst.msk [vmem:[%s651_s1 + $0x82] ss:$8 sm:$0xf] %vm3_vm0, %v82_v13   ;;  %v178_v15 = vpop.permute.xlu2 %177  }
  0x86   :  { %299 = vst.msk [vmem:[%s651_s1 + $0x82] ss:$8 sm:$0xf0] %vm3_vm0, %v82_v13  }
  0x87   :  { %301 = vst.msk [vmem:[%s651_s1 + $0xc2] ss:$8 sm:$0xf] %vm3_vm0, %v91_v14  }
  0x88   :  { %302 = vst.msk [vmem:[%s651_s1 + $0xc2] ss:$8 sm:$0xf0] %vm3_vm0, %v91_v14  }
  0x89   :  { %328 = vst.msk [vmem:[%s651_s1 + $0x45] ss:$8 sm:$0xf] %vm3_vm0, %v178_v15  }
  0x8a   :  { %329 = vst.msk [vmem:[%s651_s1 + $0x45] ss:$8 sm:$0xf0] %vm3_vm0, %v178_v15  }
  0x8c   :  { %v108_v16 = vpop.permute.xlu0 %107   ;;  %v117_v17 = vpop.permute.xlu1 %116  }
  0x8d   :  { %306 = vst.msk [vmem:[%s651_s1 + $0x43] ss:$8 sm:$0xf] %vm3_vm0, %v108_v16   ;;  %v204_v18 = vpop.permute.xlu2 %203  }
  0x8e   :  { %307 = vst.msk [vmem:[%s651_s1 + $0x43] ss:$8 sm:$0xf0] %vm3_vm0, %v108_v16  }
  0x8f   :  { %309 = vst.msk [vmem:[%s651_s1 + $0x83] ss:$8 sm:$0xf] %vm3_vm0, %v117_v17  }
  0x90   :  { %310 = vst.msk [vmem:[%s651_s1 + $0x83] ss:$8 sm:$0xf0] %vm3_vm0, %v117_v17  }
  0x91   :  { %336 = vst.msk [vmem:[%s651_s1 + $0x6] ss:$8 sm:$0xf] %vm3_vm0, %v204_v18  }
  0x92   :  { %337 = vst.msk [vmem:[%s651_s1 + $0x6] ss:$8 sm:$0xf0] %vm3_vm0, %v204_v18  }
  0x94   :  { %v134_v19 = vpop.permute.xlu0 %133   ;;  %v143_v20 = vpop.permute.xlu1 %142  }
  0x95   :  { %314 = vst.msk [vmem:[%s651_s1 + $0x4] ss:$8 sm:$0xf] %vm3_vm0, %v134_v19   ;;  %v231_v21 = vpop.permute.xlu2 %230  }
  0x96   :  { %315 = vst.msk [vmem:[%s651_s1 + $0x4] ss:$8 sm:$0xf0] %vm3_vm0, %v134_v19  }
  0x97   :  { %317 = vst.msk [vmem:[%s651_s1 + $0x44] ss:$8 sm:$0xf] %vm3_vm0, %v143_v20  }
  0x98   :  { %318 = vst.msk [vmem:[%s651_s1 + $0x44] ss:$8 sm:$0xf0] %vm3_vm0, %v143_v20  }
  0x99   :  { %345 = vst.msk [vmem:[%s651_s1 + $0xc6] ss:$8 sm:$0xf] %vm3_vm0, %v231_v21  }
  0x9a   :  { %346 = vst.msk [vmem:[%s651_s1 + $0xc6] ss:$8 sm:$0xf0] %vm3_vm0, %v231_v21  }
  0x9c   :  { %v161_v22 = vpop.permute.xlu0 %160   ;;  %v169_v23 = vpop.permute.xlu1 %168  }
  0x9d   :  { %323 = vst.msk [vmem:[%s651_s1 + $0xc4] ss:$8 sm:$0xf] %vm3_vm0, %v161_v22   ;;  %v257_v24 = vpop.permute.xlu2 %256  }
  0x9e   :  { %324 = vst.msk [vmem:[%s651_s1 + $0xc4] ss:$8 sm:$0xf0] %vm3_vm0, %v161_v22  }
  0x9f   :  { %325 = vst.msk [vmem:[%s651_s1 + $0x5] ss:$8 sm:$0xf] %vm3_vm0, %v169_v23  }
  0xa0   :  { %326 = vst.msk [vmem:[%s651_s1 + $0x5] ss:$8 sm:$0xf0] %vm3_vm0, %v169_v23  }
  0xa1   :  { %353 = vst.msk [vmem:[%s651_s1 + $0x87] ss:$8 sm:$0xf] %vm3_vm0, %v257_v24  }
  0xa2   :  { %354 = vst.msk [vmem:[%s651_s1 + $0x87] ss:$8 sm:$0xf0] %vm3_vm0, %v257_v24  }
  0xa4   :  { %v187_v25 = vpop.permute.xlu0 %186   ;;  %v196_v26 = vpop.permute.xlu1 %195  }
  0xa5   :  { %331 = vst.msk [vmem:[%s651_s1 + $0x85] ss:$8 sm:$0xf] %vm3_vm0, %v187_v25  }
  0xa6   :  { %332 = vst.msk [vmem:[%s651_s1 + $0x85] ss:$8 sm:$0xf0] %vm3_vm0, %v187_v25  }
  0xa7   :  { %334 = vst.msk [vmem:[%s651_s1 + $0xc5] ss:$8 sm:$0xf] %vm3_vm0, %v196_v26  }
  0xa8   :  { %335 = vst.msk [vmem:[%s651_s1 + $0xc5] ss:$8 sm:$0xf0] %vm3_vm0, %v196_v26  }
  0xac   :  { %v213_v27 = vpop.permute.xlu0 %212   ;;  %v222_v28 = vpop.permute.xlu1 %221  }
  0xad   :  { %339 = vst.msk [vmem:[%s651_s1 + $0x46] ss:$8 sm:$0xf] %vm3_vm0, %v213_v27  }
  0xae   :  { %340 = vst.msk [vmem:[%s651_s1 + $0x46] ss:$8 sm:$0xf0] %vm3_vm0, %v213_v27  }
  0xaf   :  { %342 = vst.msk [vmem:[%s651_s1 + $0x86] ss:$8 sm:$0xf] %vm3_vm0, %v222_v28  }
  0xb0   :  { %343 = vst.msk [vmem:[%s651_s1 + $0x86] ss:$8 sm:$0xf0] %vm3_vm0, %v222_v28  }
  0xb4   :  { %v239_v29 = vpop.permute.xlu0 %238   ;;  %v248_v30 = vpop.permute.xlu1 %247  }
  0xb5   :  { %347 = vst.msk [vmem:[%s651_s1 + $0x7] ss:$8 sm:$0xf] %vm3_vm0, %v239_v29  }
  0xb6   :  { %348 = vst.msk [vmem:[%s651_s1 + $0x7] ss:$8 sm:$0xf0] %vm3_vm0, %v239_v29  }
  0xb7   :  { %350 = vst.msk [vmem:[%s651_s1 + $0x47] ss:$8 sm:$0xf] %vm3_vm0, %v248_v30  }
  0xb8   :  { %351 = vst.msk [vmem:[%s651_s1 + $0x47] ss:$8 sm:$0xf0] %vm3_vm0, %v248_v30  }
  0xbc   :  { %v266_v31 = vpop.permute.xlu0 %265  }
  0xbd   :  { %356 = vst.msk [vmem:[%s651_s1 + $0xc7] ss:$8 sm:$0xf] %vm3_vm0, %v266_v31  }
  0xbe   :  { %357 = vst.msk [vmem:[%s651_s1 + $0xc7] ss:$8 sm:$0xf0] %vm3_vm0, %v266_v31  }

// kernel: _quan_conv2d.1
= control target key start
LH: loop header
LB: loop body
LE: loop exit
PB: predicated region body
PF: predicated region fallthrough
CT: control target
= control target key end

     0   :  { %7 = vsyncpa [#allocation3], 0  ;;  %s1381_s12 = smov [#allocation2]   ;;  %s2626_s0 = inlined_call_operand.vmem [shape: f32[4,2], index: 0, kind: input, shape index: {}]   ;;  %s2627_s1 = inlined_call_operand.vmem [shape: f32[2,4,64], index: 1, kind: input, shape index: {}]   ;;  %s2628_s2 = inlined_call_operand.vmem [shape: f32[2,4,64], index: 2, kind: output, shape index: {}]  }
   0x1   :  { %s13_s11 = sshll.u32 %s2626_s0, 4  ;;  %s14_s11 = int_to_ptr.vmem [resolvable:$true] %s13_s11 }
   0x2   :  { %16 = dma.vmem_to_smem %s14_s11, 64, %s1381_s12, [#allocation3]  }
   0x3   :  { %1379 = dma.done.wait [#allocation3], 64  }
   0x4   :  { %1380 = vsyncadd [#allocation3], 4294967232 }
   0x5   :  { %23 = sfence }
   0x6   :  { %s1328_s13 = sld [smem:[#allocation2 + $0x1]]  ;;  %v26_v0 = vld [vmem:[%s2627_s1] sm:$0x1]  ;;  %v27_v1 = vld [vmem:[%s2627_s1 + $0x4] sm:$0x1] }
   0x7   :  { %v28_v2 = vmul.f32 3.1415927, %v26_v0  ;;  %v29_v3 = vmul.f32 3.1415927, %v27_v1  ;;  %s1413_s18 = sld [smem:[#allocation2 + $0x81]] }
   0x8   :  { %v346_v4 = vld [vmem:[%s2627_s1 + $0x1] sm:$0x1]  ;;  %v1382_v35 = vmov 683565275   ;;  %v1383_v37 = vmov 2475754826  }
   0x9   :  { %v348_v8 = vmul.f32 3.1415927, %v346_v4  ;;  %v1384_v39 = vmov 2131351028   ;;  %v1385_v41 = vmov 2102212464  }
   0xa   :  { %v1386_v43 = vmov 920167782   ;;  %v1387_v52 = vmov 1326507024   ;;  %s1689_s22 = sld [smem:[#allocation2 + $0x101]] }
   0xb   :  { %s1969_s27 = sld [smem:[#allocation2]] }
   0xc   :  { %v30_v5 = vstv %s1328_s13  ;;  %s2023_s28 = sld [smem:[#allocation2 + $0x181]] }
   0xd   :  { %v1418_v6 = vsub.f32 %v28_v2, %v30_v5  ;;  %v1420_v7 = vsub.f32 %v29_v3, %v30_v5  ;;  %v350_v13 = vstv %s1413_s18  ;;  %s2552_s5 = sld [smem:[#allocation2 + $0x100]] }
   0xe   :  { %v1431_v16 = vsub.f32 %v348_v8, %v350_v13  ;;  %s2563_s6 = sld [smem:[#allocation2 + $0x180]] }
   0xf   :  { %v33_v9 = vand.u32 2147483647, %v1418_v6  ;;  %v36_v10 = vand.u32 2139095040, %v1418_v6  ;;  %v187_v11 = vand.u32 2147483647, %v1420_v7  ;;  %v190_v12 = vand.u32 2139095040, %v1420_v7 }
  0x10   :  { %v356_v23 = vand.u32 2139095040, %v1431_v16 }
  0x11   :  { %v37_v14 = vshrl.u32 %v36_v10, 23  ;;  %v40_v15 = vand.u32 8388607, %v33_v9  ;;  %v191_v17 = vshrl.u32 %v190_v12, 23  ;;  %v194_v18 = vand.u32 8388607, %v187_v11 }
  0x12   :  { %v357_v30 = vshrl.u32 %v356_v23, 23 }
  0x13   :  { %v1329_v19 = vadd.s32 4294967169, %v37_v14  ;;  %v41_v20 = vor.u32 8388608, %v40_v15  ;;  %v1332_v21 = vadd.s32 4294967169, %v191_v17  ;;  %v195_v24 = vor.u32 8388608, %v194_v18 }
  0x14   :  { %v1454_v50 = vadd.s32 4294967169, %v357_v30 }
  0x15   :  { %v43_v22 = vadd.s32 1, %v1329_v19  ;;  %v197_v25 = vadd.s32 1, %v1332_v21  ;;  %v1436_v27 = vshll.u32 %v41_v20, 8  ;;  %v1442_v33 = vshll.u32 %v195_v24, 8 }
  0x17   :  { %vm44_vm0 = vcmp.gt.s32.totalorder %v43_v22, 0  ;;  %vm198_vm1 = vcmp.gt.s32.totalorder %v197_v25, 0  ;;  %v82_v45 = vand.u32 65535, %v1436_v27  ;;  %v83_v46 = vshrl.u32 %v1436_v27, 16 }
  0x18   :  { %v45_v26 = vsel %vm44_vm0, %v43_v22, 0  ;;  %v199_v29 = vsel %vm198_vm1, %v197_v25, 0 }
  0x19   :  { %v47_v28 = vand.u32 31, %v45_v26  ;;  %v1438_v31 = vshrl.u32 %v45_v26, 5  ;;  %v1440_v32 = vand.u32 31, %v199_v29  ;;  %v1470_v63 = vshrl.u32 %v199_v29, 5 }
  0x1b   :  { %v48_v34 = vsub.s32 32, %v47_v28  ;;  %v50_v36 = vshll.u32 %v1382_v35, %v47_v28  ;;  %v53_v38 = vshll.u32 %v1383_v37, %v47_v28  ;;  %v56_v40 = vshll.u32 %v1384_v39, %v47_v28 }
  0x1c   :  { %v59_v42 = vshll.u32 %v1385_v41, %v47_v28  ;;  %v62_v44 = vshll.u32 %v1386_v43, %v47_v28  ;;  %vm65_vm2 = vcmp.lt.s32.totalorder %v1438_v31, 1  ;;  %vm68_vm3 = vcmp.lt.s32.totalorder %v1438_v31, 4 }
  0x1d   :  { %v51_v47 = vshrl.u32 %v1383_v37, %v48_v34  ;;  %v54_v48 = vshrl.u32 %v1384_v39, %v48_v34  ;;  %v57_v49 = vshrl.u32 %v1385_v41, %v48_v34  ;;  %v60_v51 = vshrl.u32 %v1386_v43, %v48_v34 }
  0x1e   :  { %v63_v53 = vshrl.u32 %v1387_v52, %v48_v34  ;;  %v1461_v57 = vsub.s32 32, %v1440_v32  ;;  %v49_v58 = vshrl.u32 %v1382_v35, %v48_v34  ;;  %vm67_vm4 = vcmp.lt.s32.totalorder %v1438_v31, 3 }
  0x1f   :  { %v52_v54 = vor.u32 %v51_v47, %v50_v36  ;;  %v55_v55 = vor.u32 %v54_v48, %v53_v38  ;;  %v58_v56 = vor.u32 %v57_v49, %v56_v40  ;;  %v61_v59 = vor.u32 %v60_v51, %v59_v42 }
  0x20   :  { %v64_v60 = vor.u32 %v63_v53, %v62_v44  ;;  %vm66_vm5 = vcmp.lt.s32.totalorder %v1438_v31, 2  ;;  %v204_v2 = vshll.u32 %v1382_v35, %v1440_v32  ;;  %v207_v3 = vshll.u32 %v1383_v37, %v1440_v32 }
  0x21   :  { %v73_v61 = vsel %vm65_vm2, %v52_v54, %v55_v55  ;;  %v77_v62 = vsel %vm65_vm2, %v55_v55, %v58_v56  ;;  %v74_v0 = vsel %vm68_vm3, %v61_v59, 920167782  ;;  %v70_v4 = vsel %vm68_vm3, %v58_v56, 2102212464 }
  0x22   :  { %v78_v1 = vsel %vm68_vm3, %v64_v60, 1326507024  ;;  %v75_v5 = vsel %vm67_vm4, %v58_v56, %v74_v0  ;;  %v205_v10 = vshrl.u32 %v1383_v37, %v1461_v57  ;;  %v69_v12 = vsel %vm65_vm2, %v49_v58, %v52_v54 }
  0x23   :  { %v79_v8 = vsel %vm67_vm4, %v61_v59, %v78_v1  ;;  %v76_v14 = vsel %vm66_vm5, %v73_v61, %v75_v5  ;;  %v208_v17 = vshrl.u32 %v1384_v39, %v1461_v57  ;;  %v71_v22 = vsel %vm67_vm4, %v55_v55, %v70_v4 }
  0x24   :  { %v80_v15 = vsel %vm66_vm5, %v77_v62, %v79_v8  ;;  %v106_v20 = vand.u32 65535, %v76_v14  ;;  %v107_v21 = vshrl.u32 %v76_v14, 16  ;;  %v1498_v23 = vor.u32 %v205_v10, %v204_v2 }
  0x25   :  { %v84_v18 = vand.u32 65535, %v80_v15  ;;  %v85_v19 = vshrl.u32 %v80_v15, 16  ;;  %v1500_v24 = vor.u32 %v208_v17, %v207_v3  ;;  %v210_v25 = vshll.u32 %v1384_v39, %v1440_v32 }
  0x26   :  { %v211_v30 = vshrl.u32 %v1385_v41, %v1461_v57  ;;  %v108_v36 = vmul.u32 %v106_v20, %v82_v45  ;;  %v109_v38 = vmul.u32 %v107_v21, %v82_v45  ;;  %v110_v40 = vmul.u32 %v106_v20, %v83_v46 }
  0x27   :  { %v86_v26 = vmul.u32 %v84_v18, %v82_v45  ;;  %v87_v28 = vmul.u32 %v85_v19, %v82_v45  ;;  %v88_v29 = vmul.u32 %v84_v18, %v83_v46  ;;  %v89_v34 = vmul.u32 %v85_v19, %v83_v46 }
  0x28   :  { %v111_v48 = vmul.u32 %v107_v21, %v83_v46  ;;  %v112_v51 = vshll.u32 %v109_v38, 16  ;;  %v113_v53 = vshrl.u32 %v109_v38, 16  ;;  %v114_v54 = vshll.u32 %v110_v40, 16 }
  0x29   :  { %v90_v42 = vshll.u32 %v87_v28, 16  ;;  %v91_v44 = vshrl.u32 %v87_v28, 16  ;;  %v92_v47 = vshll.u32 %v88_v29, 16  ;;  %v93_v49 = vshrl.u32 %v88_v29, 16 }
  0x2a   :  { %v115_v56 = vshrl.u32 %v110_v40, 16  ;;  %v213_v58 = vshll.u32 %v1385_v41, %v1440_v32  ;;  %v1388_v59 = vmov 0   ;;  %vm116_vm7 = vc.u32 %v108_v36, %v112_v51 }
  0x2b   :  { %vm94_vm6 = vc.u32 %v86_v26, %v90_v42  ;;  %v96_v55 = vadd.s32 %v90_v42, %v86_v26  ;;  %v118_v45 = vadd.s32 %v112_v51, %v108_v36  ;;  %v214_v61 = vshrl.u32 %v1386_v43, %v1461_v57 }
  0x2c   :  { %v95_v60 = vsel %vm94_vm6, 1, %v1388_v59  ;;  %v117_v46 = vsel %vm116_vm7, 1, %v1388_v59  ;;  %v216_v0 = vshll.u32 %v1386_v43, %v1440_v32  ;;  %v1515_v3 = vor.u32 %v211_v30, %v210_v25 }
  0x2d   :  { %v97_v62 = vadd.s32 %v95_v60, %v89_v34  ;;  %vm98_vm8 = vc.u32 %v96_v55, %v92_v47  ;;  %v119_v2 = vadd.s32 %v117_v46, %v111_v48  ;;  %vm120_vm9 = vc.u32 %v118_v45, %v114_v54 }
  0x2e   :  { %v99_v1 = vsel %vm98_vm8, 1, %v1388_v59  ;;  %v121_v5 = vsel %vm120_vm9, 1, %v1388_v59  ;;  %v215_v8 = vor.u32 %v214_v61, %v213_v58  ;;  %v217_v10 = vshrl.u32 %v1387_v52, %v1461_v57 }
  0x2f   :  { %v101_v4 = vadd.s32 %v99_v1, %v97_v62  ;;  %v1520_v14 = vadd.s32 %v118_v45, %v114_v54  ;;  %v123_v15 = vadd.s32 %v121_v5, %v119_v2  ;;  %vm219_vm10 = vcmp.lt.s32.totalorder %v1470_v63, 1 }
  0x30   :  { %vm221_vm11 = vcmp.lt.s32.totalorder %v1470_v63, 3  ;;  %v218_v17 = vor.u32 %v217_v10, %v216_v0  ;;  %vm220_vm12 = vcmp.lt.s32.totalorder %v1470_v63, 2  ;;  %vm222_vm13 = vcmp.lt.s32.totalorder %v1470_v63, 4 }
  0x31   :  { %v102_v32 = vadd.s32 %v101_v4, %v91_v44  ;;  %v72_v18 = vsel %vm66_vm5, %v69_v12, %v71_v22  ;;  %v124_v19 = vadd.s32 %v123_v15, %v113_v53  ;;  %v227_v20 = vsel %vm219_vm10, %v1498_v23, %v1500_v24 }
  0x32   :  { %v228_v21 = vsel %vm222_vm13, %v215_v8, 920167782  ;;  %v231_v31 = vsel %vm219_vm10, %v1500_v24, %v1515_v3  ;;  %v236_v12 = vand.u32 65535, %v1442_v33  ;;  %v232_v29 = vsel %vm222_vm13, %v218_v17, 1326507024 }
  0x33   :  { %v1534_v25 = vadd.s32 %v102_v32, %v93_v49  ;;  %v229_v26 = vsel %vm221_vm11, %v1515_v3, %v228_v21  ;;  %v125_v22 = vadd.s32 %v124_v19, %v115_v56  ;;  %v237_v30 = vshrl.u32 %v1442_v33, 16 }
  0x34   :  { %v230_v28 = vsel %vm220_vm12, %v227_v20, %v229_v26  ;;  %v126_v34 = vmul.u32 %v1436_v27, %v72_v18  ;;  %v233_v36 = vsel %vm221_vm11, %v215_v8, %v232_v29  ;;  %v363_v54 = vadd.s32 1, %v1454_v50 }
  0x35   :  { %vm128_vm14 = vc.u32 %v1534_v25, %v1520_v14  ;;  %v260_v38 = vand.u32 65535, %v230_v28  ;;  %v129_v40 = vadd.s32 1, %v125_v22  ;;  %v234_v42 = vsel %vm220_vm12, %v231_v31, %v233_v36 }
  0x36   :  { %v261_v44 = vshrl.u32 %v230_v28, 16  ;;  %v238_v47 = vand.u32 65535, %v234_v42  ;;  %v239_v48 = vshrl.u32 %v234_v42, 16  ;;  %vm364_vm15 = vcmp.gt.s32.totalorder %v363_v54, 0 }
  0x37   :  { %v130_v49 = vsel %vm128_vm14, %v129_v40, %v125_v22  ;;  %v264_v53 = vmul.u32 %v260_v38, %v237_v30  ;;  %v262_v58 = vmul.u32 %v260_v38, %v236_v12  ;;  %v365_v32 = vsel %vm364_vm15, %v363_v54, 0 }
  0x38   :  { %v263_v51 = vmul.u32 %v261_v44, %v236_v12  ;;  %v131_v27 = vadd.s32 %v130_v49, %v126_v34  ;;  %v240_v55 = vmul.u32 %v238_v47, %v236_v12  ;;  %v241_v56 = vmul.u32 %v239_v48, %v236_v12 }
  0x39   :  { %v242_v60 = vmul.u32 %v238_v47, %v237_v30  ;;  %v243_v62 = vmul.u32 %v239_v48, %v237_v30  ;;  %v265_v1 = vmul.u32 %v261_v44, %v237_v30  ;;  %v268_v2 = vshll.u32 %v264_v53, 16 }
  0x3a   :  { %v266_v45 = vshll.u32 %v263_v51, 16  ;;  %v132_v61 = vadd.s32 536870912, %v131_v27  ;;  %v244_v46 = vshll.u32 %v241_v56, 16  ;;  %v245_v20 = vshrl.u32 %v241_v56, 16 }
  0x3b   :  { %v246_v0 = vshll.u32 %v242_v60, 16  ;;  %v267_v31 = vshrl.u32 %v263_v51, 16  ;;  %v367_v22 = vand.u32 31, %v365_v32  ;;  %v353_v28 = vand.u32 2147483647, %v1431_v16 }
  0x3c   :  { %v1557_v4 = vshrl.u32 %v132_v61, 30  ;;  %vm248_vm0 = vc.u32 %v240_v55, %v244_v46  ;;  %v250_v5 = vadd.s32 %v244_v46, %v240_v55  ;;  %vm270_vm1 = vc.u32 %v262_v58, %v266_v45 }
  0x3d   :  { %v249_v50 = vsel %vm248_vm0, 1, %v1388_v59  ;;  %v271_v8 = vsel %vm270_vm1, 1, %v1388_v59  ;;  %v272_v10 = vadd.s32 %v266_v45, %v262_v58  ;;  %v203_v29 = vshrl.u32 %v1382_v35, %v1461_v57 }
  0x3e   :  { %v251_v15 = vadd.s32 %v249_v50, %v243_v62  ;;  %vm252_vm2 = vc.u32 %v250_v5, %v246_v0  ;;  %v273_v18 = vadd.s32 %v271_v8, %v265_v1  ;;  %v134_v19 = vshll.u32 %v1557_v4, 30 }
  0x3f   :  { %v253_v17 = vsel %vm252_vm2, 1, %v1388_v59  ;;  %vm274_vm3 = vc.u32 %v272_v10, %v268_v2  ;;  %v224_v34 = vsel %vm222_vm13, %v1515_v3, 2102212464  ;;  %v247_v36 = vshrl.u32 %v242_v60, 16 }
  0x40   :  { %v275_v21 = vsel %vm274_vm3, 1, %v1388_v59  ;;  %v255_v26 = vadd.s32 %v253_v17, %v251_v15  ;;  %v1567_v30 = vsub.s32 %v131_v27, %v134_v19  ;;  %v269_v40 = vshrl.u32 %v264_v53, 16 }
  0x41   :  { %v277_v12 = vadd.s32 %v275_v21, %v273_v18  ;;  %v1572_v44 = vsub.s32 32, %v367_v22  ;;  %v360_v47 = vand.u32 8388607, %v353_v28  ;;  %v223_v48 = vsel %vm219_vm10, %v203_v29, %v1498_v23 }
  0x42   :  { %v256_v38 = vadd.s32 %v255_v26, %v245_v20  ;;  %v225_v57 = vsel %vm221_vm11, %v1500_v24, %v224_v34  ;;  %v1582_v49 = vadd.s32 %v272_v10, %v268_v2  ;;  %v1584_v3 = vshrl.u32 %v365_v32, 5 }
  0x43   :  { %v278_v42 = vadd.s32 %v277_v12, %v267_v31  ;;  %vm136_vm4 = vcmp.lt.s32.totalorder %v1567_v30, 0  ;;  %v137_v51 = vsub.s32 0, %v1567_v30  ;;  %v370_v53 = vshll.u32 %v1382_v35, %v367_v22 }
  0x44   :  { %v373_v54 = vshll.u32 %v1383_v37, %v367_v22  ;;  %v1590_v27 = vadd.s32 %v256_v38, %v247_v36  ;;  %v379_v23 = vshll.u32 %v1385_v41, %v367_v22  ;;  %v380_v24 = vshrl.u32 %v1386_v43, %v1572_v44 }
  0x45   :  { %v279_v55 = vadd.s32 %v278_v42, %v269_v40  ;;  %v371_v56 = vshrl.u32 %v1383_v37, %v1572_v44  ;;  %v374_v58 = vshrl.u32 %v1384_v39, %v1572_v44  ;;  %v376_v60 = vshll.u32 %v1384_v39, %v367_v22 }
  0x46   :  { %v377_v45 = vshrl.u32 %v1385_v41, %v1572_v44  ;;  %v382_v61 = vshll.u32 %v1386_v43, %v367_v22  ;;  %v383_v62 = vshrl.u32 %v1387_v52, %v1572_v44  ;;  %v226_v46 = vsel %vm220_vm12, %v223_v48, %v225_v57 }
  0x47   :  { %v361_v0 = vor.u32 8388608, %v360_v47  ;;  %v138_v1 = vsel %vm136_vm4, %v137_v51, %v1567_v30  ;;  %vm282_vm5 = vc.u32 %v1590_v27, %v1582_v49  ;;  %v283_v2 = vadd.s32 1, %v279_v55 }
  0x48   :  { %v381_v5 = vor.u32 %v380_v24, %v379_v23  ;;  %v1612_v50 = vor.u32 %v371_v56, %v370_v53  ;;  %v1614_v8 = vor.u32 %v374_v58, %v373_v54  ;;  %v1616_v10 = vor.u32 %v377_v45, %v376_v60  ;;  %v347_v23 = vld [vmem:[%s2627_s1 + $0x5] sm:$0x1] }
  0x49   :  { %vm388_vm6 = vcmp.lt.s32.totalorder %v1584_v3, 4  ;;  %v384_v63 = vor.u32 %v383_v62, %v382_v61  ;;  %vm385_vm7 = vcmp.lt.s32.totalorder %v1584_v3, 1  ;;  %vm387_vm8 = vcmp.lt.s32.totalorder %v1584_v3, 3 }
  0x4a   :  { %v280_v15 = vmul.u32 %v1442_v33, %v226_v46  ;;  %v139_v32 = vclz %v138_v1  ;;  %v284_v17 = vsel %vm282_vm5, %v283_v2, %v279_v55  ;;  %v394_v18 = vsel %vm388_vm6, %v381_v5, 920167782 }
  0x4b   :  { %v1624_v19 = vshll.u32 %v361_v0, 8  ;;  %vm386_vm9 = vcmp.lt.s32.totalorder %v1584_v3, 2  ;;  %v393_v20 = vsel %vm385_vm7, %v1612_v50, %v1614_v8  ;;  %v395_v21 = vsel %vm387_vm8, %v1616_v10, %v394_v18  ;;  %v666_v3 = vld [vmem:[%s2627_s1 + $0x2] sm:$0x1] }
  0x4c   :  { %v397_v33 = vsel %vm385_vm7, %v1614_v8, %v1616_v10  ;;  %v398_v26 = vsel %vm388_vm6, %v384_v63, 1326507024  ;;  %v1330_v12 = vadd.s32 4294967294, %v139_v32  ;;  %v285_v22 = vadd.s32 %v284_v17, %v280_v15 }
  0x4d   :  { %v399_v31 = vsel %vm387_vm8, %v381_v5, %v398_v26  ;;  %v396_v29 = vsel %vm386_vm9, %v393_v20, %v395_v21  ;;  %v402_v36 = vand.u32 65535, %v1624_v19  ;;  %v403_v47 = vshrl.u32 %v1624_v19, 16 }
  0x4e   :  { %v400_v34 = vsel %vm386_vm9, %v397_v33, %v399_v31  ;;  %v427_v40 = vshrl.u32 %v396_v29, 16  ;;  %vm1331_vm10 = vcmp.lt.s32.totalorder %v1330_v12, 0  ;;  %v286_v42 = vadd.s32 536870912, %v285_v22 }
  0x4f   :  { %v405_v38 = vshrl.u32 %v400_v34, 16  ;;  %v404_v48 = vand.u32 65535, %v400_v34  ;;  %v426_v51 = vand.u32 65535, %v396_v29  ;;  %v142_v53 = vsel %vm1331_vm10, 0, %v1330_v12 }
  0x50   :  { %v429_v54 = vmul.u32 %v427_v40, %v402_v36  ;;  %v1648_v55 = vshrl.u32 %v286_v42, 30  ;;  %v147_v60 = vsub.s32 4294967266, %v142_v53  ;;  %v349_v0 = vmul.f32 3.1415927, %v347_v23 }
  0x51   :  { %v407_v57 = vmul.u32 %v405_v38, %v402_v36  ;;  %v406_v24 = vmul.u32 %v404_v48, %v402_v36  ;;  %v408_v56 = vmul.u32 %v404_v48, %v403_v47  ;;  %v430_v45 = vmul.u32 %v426_v51, %v403_v47 }
  0x52   :  { %v428_v61 = vmul.u32 %v426_v51, %v402_v36  ;;  %v432_v62 = vshll.u32 %v429_v54, 16  ;;  %v288_v46 = vshll.u32 %v1648_v55, 30  ;;  %v127_v5 = vadd.s32 %v1520_v14, %v1534_v25 }
  0x53   :  { %v410_v58 = vshll.u32 %v407_v57, 16  ;;  %v412_v1 = vshll.u32 %v408_v56, 16  ;;  %v143_v63 = vsub.s32 32, %v142_v53  ;;  %v148_v15 = vadd.s32 127, %v147_v60 }
  0x54   :  { %v434_v32 = vshll.u32 %v430_v45, 16  ;;  %v409_v17 = vmul.u32 %v405_v38, %v403_v47  ;;  %vm436_vm12 = vc.u32 %v428_v61, %v432_v62  ;;  %v438_v18 = vadd.s32 %v432_v62, %v428_v61 }
  0x55   :  { %vm414_vm11 = vc.u32 %v406_v24, %v410_v58  ;;  %v416_v2 = vadd.s32 %v410_v58, %v406_v24  ;;  %v1656_v20 = vsub.s32 %v285_v22, %v288_v46  ;;  %v1660_v21 = vsub.f32 %v349_v0, %v350_v13 }
  0x56   :  { %v415_v33 = vsel %vm414_vm11, 1, %v1388_v59  ;;  %v431_v26 = vmul.u32 %v427_v40, %v403_v47  ;;  %v437_v31 = vsel %vm436_vm12, 1, %v1388_v59  ;;  %v144_v12 = vshll.u32 %v1567_v30, %v142_v53 }
  0x57   :  { %vm418_vm13 = vc.u32 %v416_v2, %v412_v1  ;;  %v145_v14 = vshrl.u32 %v127_v5, %v143_v63  ;;  %v149_v25 = vshll.u32 %v148_v15, 23  ;;  %vm440_vm14 = vc.u32 %v438_v18, %v434_v32 }
  0x58   :  { %v417_v29 = vadd.s32 %v415_v33, %v409_v17  ;;  %v291_v34 = vsub.s32 0, %v1656_v20  ;;  %v419_v22 = vsel %vm418_vm13, 1, %v1388_v59  ;;  %v439_v36 = vadd.s32 %v437_v31, %v431_v26 }
  0x59   :  { %v510_v13 = vand.u32 2139095040, %v1660_v21  ;;  %vm290_vm15 = vcmp.lt.s32.totalorder %v1656_v20, 0  ;;  %v441_v38 = vsel %vm440_vm14, 1, %v1388_v59  ;;  %v146_v40 = vor.u32 %v145_v14, %v144_v12 }
  0x5a   :  { %v150_v42 = vor.u32 4788187, %v149_v25  ;;  %v411_v48 = vshrl.u32 %v407_v57, 16  ;;  %v421_v30 = vadd.s32 %v419_v22, %v417_v29  ;;  %v292_v51 = vsel %vm290_vm15, %v291_v34, %v1656_v20 }
  0x5b   :  { %v511_v47 = vshrl.u32 %v510_v13, 23  ;;  %v433_v53 = vshrl.u32 %v429_v54, 16  ;;  %v443_v23 = vadd.s32 %v441_v38, %v439_v36  ;;  %v153_v60 = vcvt.s32.f32 %v146_v40 }
  0x5c   :  { %v151_v58 = vand.u32 2147483647, %v150_v42  ;;  %v369_v61 = vshrl.u32 %v1382_v35, %v1572_v44  ;;  %v293_v46 = vclz %v292_v51  ;;  %v390_v0 = vsel %vm388_vm6, %v1616_v10, 2102212464 }
  0x5d   :  { %v1340_v24 = vadd.s32 4294967169, %v511_v47  ;;  %v413_v1 = vshrl.u32 %v408_v56, 16  ;;  %v422_v2 = vadd.s32 %v421_v30, %v411_v48  ;;  %v435_v57 = vshrl.u32 %v430_v45, 16 }
  0x5e   :  { %v444_v5 = vadd.s32 %v443_v23, %v433_v53  ;;  %v154_v54 = vmul.f32 %v153_v60, %v151_v58  ;;  %v389_v15 = vsel %vm385_vm7, %v369_v61, %v1612_v50  ;;  %v391_v44 = vsel %vm387_vm8, %v1614_v8, %v390_v0 }
  0x5f   :  { %v517_v62 = vadd.s32 1, %v1340_v24  ;;  %v1333_v33 = vadd.s32 4294967294, %v293_v46  ;;  %v1682_v26 = vadd.s32 %v422_v2, %v413_v1  ;;  %v1684_v10 = vadd.s32 %v438_v18, %v434_v32 }
  0x60   :  { %v2630_v56 = vand.u32 2147483647, %v1660_v21  ;;  %v445_v45 = vadd.s32 %v444_v5, %v435_v57  ;;  %vm35_vm1 = vcmp.lt.s32.totalorder %v1418_v6, 0  ;;  %v155_v50 = vxor.u32 2147483648, %v154_v54 }
  0x61   :  { %vm518_vm0 = vcmp.gt.s32.totalorder %v517_v62, 0  ;;  %v392_v12 = vsel %vm386_vm9, %v389_v15, %v391_v44  ;;  %vm1334_vm2 = vcmp.lt.s32.totalorder %v1333_v33, 0  ;;  %vm448_vm3 = vc.u32 %v1682_v26, %v1684_v10 }
  0x62   :  { %v519_v63 = vsel %vm518_vm0, %v517_v62, 0  ;;  %v514_v8 = vand.u32 8388607, %v2630_v56  ;;  %v449_v18 = vadd.s32 1, %v445_v45  ;;  %vm1715_vm4 = vcmp.le.f32.partialorder %v33_v9, 0.7853982 }
  0x63   :  { %v521_v17 = vand.u32 31, %v519_v63  ;;  %v296_v40 = vsel %vm1334_vm2, 0, %v1333_v33  ;;  %v446_v42 = vmul.u32 %v1624_v19, %v392_v12  ;;  %v1720_v47 = vshrl.u32 %v519_v63, 5 }
  0x64   :  { %v668_v53 = vmul.f32 3.1415927, %v666_v3  ;;  %v156_v23 = vsel %vm35_vm1, %v155_v50, %v154_v54  ;;  %v450_v9 = vsel %vm448_vm3, %v449_v18, %v445_v45  ;;  %v515_v24 = vor.u32 8388608, %v514_v8 }
  0x65   :  { %v1687_v31 = vsub.s32 32, %v521_v17  ;;  %v533_v32 = vshll.u32 %v1385_v41, %v521_v17  ;;  %v524_v14 = vshll.u32 %v1382_v35, %v521_v17  ;;  %v527_v25 = vshll.u32 %v1383_v37, %v521_v17 }
  0x66   :  { %v530_v36 = vshll.u32 %v1384_v39, %v521_v17  ;;  %v536_v30 = vshll.u32 %v1386_v43, %v521_v17  ;;  %v670_v58 = vstv %s1689_s22  ;;  %v301_v19 = vsub.s32 4294967266, %v296_v40 }
  0x67   :  { %v534_v29 = vshrl.u32 %v1386_v43, %v1687_v31  ;;  %v525_v34 = vshrl.u32 %v1383_v37, %v1687_v31  ;;  %v528_v22 = vshrl.u32 %v1384_v39, %v1687_v31  ;;  %v531_v13 = vshrl.u32 %v1385_v41, %v1687_v31 }
  0x68   :  { %v537_v51 = vshrl.u32 %v1387_v52, %v1687_v31  ;;  %vm539_vm5 = vcmp.lt.s32.totalorder %v1720_v47, 1  ;;  %vm541_vm6 = vcmp.lt.s32.totalorder %v1720_v47, 3  ;;  %vm542_vm7 = vcmp.lt.s32.totalorder %v1720_v47, 4 }
  0x69   :  { %v535_v48 = vor.u32 %v534_v29, %v533_v32  ;;  %v1731_v60 = vor.u32 %v525_v34, %v524_v14  ;;  %v1733_v61 = vor.u32 %v528_v22, %v527_v25  ;;  %v1735_v62 = vor.u32 %v531_v13, %v530_v36 }
  0x6a   :  { %v538_v46 = vor.u32 %v537_v51, %v536_v30  ;;  %v1743_v0 = vsel %vm1715_vm4, %v1418_v6, %v156_v23  ;;  %v451_v1 = vadd.s32 %v450_v9, %v446_v42  ;;  %v1749_v57 = vsub.f32 %v668_v53, %v670_v58 }
  0x6b   :  { %v548_v2 = vsel %vm542_vm7, %v535_v48, 920167782  ;;  %v281_v5 = vadd.s32 %v1582_v49, %v1590_v27  ;;  %v1753_v63 = vshll.u32 %v515_v24, 8  ;;  %v297_v54 = vsub.s32 32, %v296_v40 }
  0x6c   :  { %vm540_vm8 = vcmp.lt.s32.totalorder %v1720_v47, 2  ;;  %v547_v15 = vsel %vm539_vm5, %v1731_v60, %v1733_v61  ;;  %v549_v44 = vsel %vm541_vm6, %v1735_v62, %v548_v2  ;;  %v1765_v17 = vmul.f32 %v1743_v0, %v1743_v0 }
  0x6d   :  { %v302_v33 = vadd.s32 127, %v301_v19  ;;  %v552_v49 = vsel %vm542_vm7, %v538_v46, 1326507024  ;;  %v452_v27 = vadd.s32 536870912, %v451_v1  ;;  %v551_v45 = vsel %vm539_vm5, %v1733_v61, %v1735_v62 }
  0x6e   :  { %v676_v50 = vand.u32 2139095040, %v1749_v57  ;;  %v162_v12 = vmul.f32 -0.001358992, %v1765_v17  ;;  %v550_v8 = vsel %vm540_vm8, %v547_v15, %v549_v44  ;;  %v556_v32 = vand.u32 65535, %v1753_v63 }
  0x6f   :  { %v557_v18 = vshrl.u32 %v1753_v63, 16  ;;  %v298_v14 = vshll.u32 %v1656_v20, %v296_v40  ;;  %v299_v25 = vshrl.u32 %v281_v5, %v297_v54  ;;  %v553_v29 = vsel %vm541_vm6, %v535_v48, %v552_v49 }
  0x70   :  { %v580_v3 = vand.u32 65535, %v550_v8  ;;  %v303_v34 = vshll.u32 %v302_v33, 23  ;;  %v554_v22 = vsel %vm540_vm8, %v551_v45, %v553_v29  ;;  %v581_v36 = vshrl.u32 %v550_v8, 16 }
  0x71   :  { %v1784_v13 = vshrl.u32 %v452_v27, 30  ;;  %v558_v42 = vand.u32 65535, %v554_v22  ;;  %v559_v30 = vshrl.u32 %v554_v22, 16  ;;  %v677_v51 = vshrl.u32 %v676_v50, 23 }
  0x72   :  { %v169_v53 = vmul.f32 -0.00019511016, %v1765_v17  ;;  %v582_v23 = vmul.u32 %v580_v3, %v556_v32  ;;  %v583_v9 = vmul.u32 %v581_v36, %v556_v32  ;;  %v1787_v20 = vmul.u32 %v580_v3, %v557_v18 }
  0x73   :  { %v163_v40 = vadd.f32 0.041655596, %v162_v12  ;;  %v300_v24 = vor.u32 %v299_v25, %v298_v14  ;;  %v560_v48 = vmul.u32 %v558_v42, %v556_v32  ;;  %v561_v19 = vmul.u32 %v559_v30, %v556_v32 }
  0x74   :  { %v304_v46 = vor.u32 4788187, %v303_v34  ;;  %v562_v2 = vmul.u32 %v558_v42, %v557_v18  ;;  %v585_v5 = vmul.u32 %v581_v36, %v557_v18  ;;  %v586_v54 = vshll.u32 %v583_v9, 16 }
  0x75   :  { %v454_v15 = vshll.u32 %v1784_v13, 30  ;;  %v563_v44 = vmul.u32 %v559_v30, %v557_v18  ;;  %v564_v33 = vshll.u32 %v561_v19, 16  ;;  %v1345_v49 = vadd.s32 4294967169, %v677_v51 }
  0x76   :  { %v170_v27 = vadd.f32 0.008332121, %v169_v53  ;;  %v566_v45 = vshll.u32 %v562_v2, 16  ;;  %v588_v50 = vshll.u32 %v1787_v20, 16  ;;  %vm590_vm9 = vc.u32 %v582_v23, %v586_v54 }
  0x77   :  { %v307_v8 = vcvt.s32.f32 %v300_v24  ;;  %vm568_vm10 = vc.u32 %v560_v48, %v564_v33  ;;  %v570_v12 = vadd.s32 %v564_v33, %v560_v48  ;;  %v591_v14 = vsel %vm590_vm9, 1, %v1388_v59 }
  0x78   :  { %v305_v32 = vand.u32 2147483647, %v304_v46  ;;  %v569_v25 = vsel %vm568_vm10, 1, %v1388_v59  ;;  %v592_v29 = vadd.s32 %v586_v54, %v582_v23  ;;  %v593_v3 = vadd.s32 %v591_v14, %v585_v5 }
  0x79   :  { %v1793_v34 = vsub.s32 %v451_v1, %v454_v15  ;;  %v571_v18 = vadd.s32 %v569_v25, %v563_v44  ;;  %vm572_vm11 = vc.u32 %v570_v12, %v566_v45  ;;  %v683_v22 = vadd.s32 1, %v1345_v49 }
  0x7a   :  { %v565_v36 = vshrl.u32 %v561_v19, 16  ;;  %v573_v42 = vsel %vm572_vm11, 1, %v1388_v59  ;;  %v587_v30 = vshrl.u32 %v583_v9, 16  ;;  %vm594_vm12 = vc.u32 %v592_v29, %v588_v50 }
  0x7b   :  { %v164_v51 = vmul.f32 %v163_v40, %v1765_v17  ;;  %v575_v53 = vadd.s32 %v573_v42, %v571_v18  ;;  %v595_v24 = vsel %vm594_vm12, 1, %v1388_v59  ;;  %vm684_vm13 = vcmp.gt.s32.totalorder %v683_v22, 0 }
  0x7c   :  { %v308_v48 = vmul.f32 %v307_v8, %v305_v32  ;;  %v597_v46 = vadd.s32 %v595_v24, %v593_v3  ;;  %v2629_v23 = vand.u32 2147483647, %v1749_v57  ;;  %v685_v1 = vsel %vm684_vm13, %v683_v22, 0 }
  0x7d   :  { %v457_v5 = vsub.s32 0, %v1793_v34  ;;  %v523_v19 = vshrl.u32 %v1382_v35, %v1687_v31  ;;  %v589_v54 = vshrl.u32 %v1787_v20, 16  ;;  %v687_v9 = vand.u32 31, %v685_v1 }
  0x7e   :  { %vm456_vm14 = vcmp.lt.s32.totalorder %v1793_v34, 0  ;;  %v567_v40 = vshrl.u32 %v562_v2, 16  ;;  %v576_v15 = vadd.s32 %v575_v53, %v565_v36  ;;  %v598_v44 = vadd.s32 %v597_v46, %v587_v30 }
  0x7f   :  { %vm189_vm15 = vcmp.lt.s32.totalorder %v1420_v7, 0  ;;  %v544_v33 = vsel %vm542_vm7, %v1735_v62, 2102212464  ;;  %v1808_v49 = vsub.s32 32, %v687_v9  ;;  %v157_v45 = vsub.s32 4, %v1557_v4 }
  0x80   :  { %v165_v8 = vadd.f32 -0.4999988, %v164_v51  ;;  %v171_v31 = vmul.f32 %v170_v27, %v1765_v17  ;;  %vm1814_vm0 = vcmp.le.f32.partialorder %v187_v11, 0.7853982  ;;  %v309_v2 = vxor.u32 2147483648, %v308_v48 }
  0x81   :  { %v458_v12 = vsel %vm456_vm14, %v457_v5, %v1793_v34  ;;  %v543_v62 = vsel %vm539_vm5, %v523_v19, %v1731_v60  ;;  %v599_v14 = vadd.s32 %v598_v44, %v589_v54  ;;  %v680_v32 = vand.u32 8388607, %v2629_v23 }
  0x82   :  { %v545_v27 = vsel %vm541_vm6, %v1733_v61, %v544_v33  ;;  %v1827_v25 = vadd.s32 %v576_v15, %v567_v40  ;;  %v1829_v11 = vadd.s32 %v592_v29, %v588_v50  ;;  %v690_v3 = vshll.u32 %v1382_v35, %v687_v9 }
  0x83   :  { %v691_v18 = vshrl.u32 %v1383_v37, %v1808_v49  ;;  %v693_v22 = vshll.u32 %v1383_v37, %v687_v9  ;;  %v694_v60 = vshrl.u32 %v1384_v39, %v1808_v49  ;;  %v699_v36 = vshll.u32 %v1385_v41, %v687_v9 }
  0x84   :  { %v1838_v42 = vshrl.u32 %v685_v1, 5  ;;  %v696_v61 = vshll.u32 %v1384_v39, %v687_v9  ;;  %v697_v50 = vshrl.u32 %v1385_v41, %v1808_v49  ;;  %v700_v29 = vshrl.u32 %v1386_v43, %v1808_v49 }
  0x85   :  { %v172_v30 = vadd.f32 -0.16666654, %v171_v31  ;;  %v546_v51 = vsel %vm540_vm8, %v543_v62, %v545_v27  ;;  %v603_v53 = vadd.s32 1, %v599_v14  ;;  %v681_v24 = vor.u32 8388608, %v680_v32 }
  0x86   :  { %vm602_vm2 = vc.u32 %v1827_v25, %v1829_v11  ;;  %v701_v46 = vor.u32 %v700_v29, %v699_v36  ;;  %v702_v1 = vshll.u32 %v1386_v43, %v687_v9  ;;  %v703_v5 = vshrl.u32 %v1387_v52, %v1808_v49 }
  0x87   :  { %v310_v19 = vsel %vm189_vm15, %v309_v2, %v308_v48  ;;  %v459_v54 = vclz %v458_v12  ;;  %v1854_v40 = vor.u32 %v691_v18, %v690_v3  ;;  %v1856_v15 = vor.u32 %v694_v60, %v693_v22  ;;  %v667_v18 = vld [vmem:[%s2627_s1 + $0x6] sm:$0x1] }
  0x88   :  { %v600_v47 = vmul.u32 %v1753_v63, %v546_v51  ;;  %v1859_v44 = vor.u32 %v697_v50, %v696_v61  ;;  %v704_v33 = vor.u32 %v703_v5, %v702_v1  ;;  %vm705_vm3 = vcmp.lt.s32.totalorder %v1838_v42, 1 }
  0x89   :  { %v158_v9 = vsel %vm35_vm1, %v157_v45, %v1557_v4  ;;  %v604_v31 = vsel %vm602_vm2, %v603_v53, %v599_v14  ;;  %vm707_vm5 = vcmp.lt.s32.totalorder %v1838_v42, 3  ;;  %vm708_vm6 = vcmp.lt.s32.totalorder %v1838_v42, 4 }
  0x8a   :  { %v166_v48 = vmul.f32 %v165_v8, %v1765_v17  ;;  %v173_v2 = vmul.f32 %v172_v30, %v1765_v17  ;;  %v714_v63 = vsel %vm708_vm6, %v701_v46, 920167782  ;;  %v1871_v12 = vshll.u32 %v681_v24, 8 }
  0x8b   :  { %v1876_v62 = vsel %vm1814_vm0, %v1420_v7, %v310_v19  ;;  %v1338_v4 = vadd.s32 4294967294, %v459_v54  ;;  %vm706_vm1 = vcmp.lt.s32.totalorder %v1838_v42, 2  ;;  %v713_v45 = vsel %vm705_vm3, %v1854_v40, %v1856_v15 }
  0x8c   :  { %v1883_v8 = vadd.s32 %v604_v31, %v600_v47  ;;  %v715_v17 = vsel %vm707_vm5, %v1859_v44, %v714_v63  ;;  %v717_v14 = vsel %vm705_vm3, %v1856_v15, %v1859_v44  ;;  %v718_v32 = vsel %vm708_vm6, %v704_v33, 1326507024 }
  0x8d   :  { %v160_v27 = vsel %vm1715_vm4, 0, %v158_v9  ;;  %v311_v3 = vsub.s32 4, %v1648_v55  ;;  %v716_v22 = vsel %vm706_vm1, %v713_v45, %v715_v17  ;;  %v719_v60 = vsel %vm707_vm5, %v701_v46, %v718_v32 }
  0x8e   :  { %v722_v36 = vand.u32 65535, %v1871_v12  ;;  %v723_v61 = vshrl.u32 %v1871_v12, 16  ;;  %v1906_v50 = vadd.f32 1.0, %v166_v48  ;;  %v174_v38 = vadd.f32 1.0, %v173_v2 }
  0x8f   :  { %v1910_v29 = vmul.f32 %v1876_v62, %v1876_v62  ;;  %v720_v30 = vsel %vm706_vm1, %v717_v14, %v719_v60  ;;  %vm1339_vm4 = vcmp.lt.s32.totalorder %v1338_v4, 0  ;;  %v606_v51 = vadd.s32 536870912, %v1883_v8 }
  0x90   :  { %v724_v53 = vand.u32 65535, %v720_v30  ;;  %v725_v24 = vshrl.u32 %v720_v30, 16  ;;  %v1915_v46 = vand.u32 3, %v160_v27  ;;  %v669_v1 = vmul.f32 3.1415927, %v667_v18 }
  0x91   :  { %v746_v5 = vand.u32 65535, %v716_v22  ;;  %v747_v19 = vshrl.u32 %v716_v22, 16  ;;  %v316_v54 = vmul.f32 -0.001358992, %v1910_v29  ;;  %v1919_v31 = vmul.f32 %v174_v38, %v1743_v0 }
  0x92   :  { %v726_v47 = vmul.u32 %v724_v53, %v722_v36  ;;  %v727_v33 = vmul.u32 %v725_v24, %v722_v36  ;;  %v728_v9 = vmul.u32 %v724_v53, %v723_v61  ;;  %v1924_v48 = vsel %vm189_vm15, %v311_v3, %v1648_v55 }
  0x93   :  { %v1926_v2 = vsel %vm1339_vm4, 0, %v1338_v4  ;;  %v749_v63 = vmul.u32 %v747_v19, %v722_v36  ;;  %v183_v45 = vxor.u32 2147483648, %v1906_v50  ;;  %v323_v17 = vmul.f32 -0.00019511016, %v1910_v29 }
  0x94   :  { %v1930_v14 = vshrl.u32 %v606_v51, 30  ;;  %v730_v32 = vshll.u32 %v727_v33, 16  ;;  %v447_v27 = vadd.s32 %v1684_v10, %v1682_v26  ;;  %v729_v0 = vmul.u32 %v725_v24, %v723_v61 }
  0x95   :  { %v732_v18 = vshll.u32 %v728_v9, 16  ;;  %v750_v22 = vmul.u32 %v746_v5, %v723_v61  ;;  %v317_v60 = vadd.f32 0.041655596, %v316_v54  ;;  %v467_v55 = vsub.s32 4294967266, %v1926_v2 }
  0x96   :  { %v1937_v4 = vsub.f32 %v669_v1, %v670_v58  ;;  %vm734_vm7 = vc.u32 %v726_v47, %v730_v32  ;;  %v736_v38 = vadd.s32 %v730_v32, %v726_v47  ;;  %v748_v30 = vmul.u32 %v746_v5, %v722_v36 }
  0x97   :  { %v735_v3 = vsel %vm734_vm7, 1, %v1388_v59  ;;  %v752_v51 = vshll.u32 %v749_v63, 16  ;;  %v324_v53 = vadd.f32 0.008332121, %v323_v17  ;;  %v463_v23 = vsub.s32 32, %v1926_v2 }
  0x98   :  { %v608_v26 = vshll.u32 %v1930_v14, 30  ;;  %v731_v10 = vshrl.u32 %v727_v33, 16  ;;  %v737_v24 = vadd.s32 %v735_v3, %v729_v0  ;;  %vm738_vm8 = vc.u32 %v736_v38, %v732_v18 }
  0x99   :  { %v751_v54 = vmul.u32 %v747_v19, %v723_v61  ;;  %v754_v56 = vshll.u32 %v750_v22, 16  ;;  %vm179_vm9 = vcmp.eq.s32.totalorder %v1915_v46, 0  ;;  %v468_v58 = vadd.s32 127, %v467_v55 }
  0x9a   :  { %v689_v1 = vshrl.u32 %v1382_v35, %v1808_v49  ;;  %v710_v36 = vsel %vm708_vm6, %v1859_v44, 2102212464  ;;  %v739_v5 = vsel %vm738_vm8, 1, %v1388_v59  ;;  %vm756_vm10 = vc.u32 %v748_v30, %v752_v51 }
  0x9b   :  { %v741_v47 = vadd.s32 %v739_v5, %v737_v24  ;;  %v758_v17 = vadd.s32 %v752_v51, %v748_v30  ;;  %v830_v33 = vand.u32 2139095040, %v1937_v4  ;;  %v464_v61 = vshll.u32 %v1793_v34, %v1926_v2 }
  0x9c   :  { %v1953_v19 = vsub.s32 %v1883_v8, %v608_v26  ;;  %v733_v32 = vshrl.u32 %v728_v9, 16  ;;  %v757_v49 = vsel %vm756_vm10, 1, %v1388_v59  ;;  %v753_v18 = vshrl.u32 %v749_v63, 16 }
  0x9d   :  { %v742_v0 = vadd.s32 %v741_v47, %v731_v10  ;;  %v759_v55 = vadd.s32 %v757_v49, %v751_v54  ;;  %vm760_vm11 = vc.u32 %v758_v17, %v754_v56  ;;  %v465_v44 = vshrl.u32 %v447_v27, %v463_v23 }
  0x9e   :  { %v709_v3 = vsel %vm705_vm3, %v689_v1, %v1854_v40  ;;  %v711_v38 = vsel %vm707_vm5, %v1856_v15, %v710_v36  ;;  %v761_v34 = vsel %vm760_vm11, 1, %v1388_v59  ;;  %v469_v8 = vshll.u32 %v468_v58, 23 }
  0x9f   :  { %v755_v2 = vshrl.u32 %v750_v22, 16  ;;  %v763_v9 = vadd.s32 %v761_v34, %v759_v55  ;;  %v831_v30 = vshrl.u32 %v830_v33, 23  ;;  %v180_v51 = vxor.u32 2147483648, %v1919_v31 }
  0xa0   :  { %v611_v63 = vsub.s32 0, %v1953_v19  ;;  %v1965_v26 = vadd.s32 %v742_v0, %v733_v32  ;;  %v1967_v23 = vadd.s32 %v758_v17, %v754_v56  ;;  %vm610_vm12 = vcmp.lt.s32.totalorder %v1953_v19, 0 }
  0xa1   :  { %v712_v40 = vsel %vm706_vm1, %v709_v3, %v711_v38  ;;  %v764_v15 = vadd.s32 %v763_v9, %v753_v18  ;;  %v1348_v27 = vadd.s32 4294967169, %v831_v30  ;;  %vm182_vm13 = vcmp.eq.s32.totalorder %v1915_v46, 2 }
  0xa2   :  { %v318_v22 = vmul.f32 %v317_v60, %v1910_v29  ;;  %v325_v10 = vmul.f32 %v324_v53, %v1910_v29  ;;  %v466_v24 = vor.u32 %v465_v44, %v464_v61  ;;  %vm178_vm14 = vcmp.lt.s32.totalorder %v1915_v46, 2 }
  0xa3   :  { %v470_v56 = vor.u32 4788187, %v469_v8  ;;  %v765_v54 = vadd.s32 %v764_v15, %v755_v2  ;;  %v837_v58 = vadd.s32 1, %v1348_v27  ;;  %v314_v1 = vsel %vm1814_vm0, 0, %v1924_v48 }
  0xa4   :  { %v612_v42 = vsel %vm610_vm12, %v611_v63, %v1953_v19  ;;  %v766_v36 = vmul.u32 %v1871_v12, %v712_v40  ;;  %vm768_vm15 = vc.u32 %v1965_v26, %v1967_v23  ;;  %v181_v60 = vsel %vm179_vm9, %v1906_v50, %v180_v51 }
  0xa5   :  { %v184_v53 = vsel %vm182_vm13, %v183_v45, %v1919_v31  ;;  %v769_v5 = vadd.s32 1, %v765_v54  ;;  %vm838_vm2 = vcmp.gt.s32.totalorder %v837_v58, 0  ;;  %v319_v20 = vadd.f32 -0.4999988, %v318_v22 }
  0xa6   :  { %v326_v48 = vadd.f32 -0.16666654, %v325_v10  ;;  %v473_v47 = vcvt.s32.f32 %v466_v24  ;;  %v839_v17 = vsel %vm838_vm2, %v837_v58, 0  ;;  %v471_v33 = vand.u32 2147483647, %v470_v56 }
  0xa7   :  { %v613_v12 = vclz %v612_v42  ;;  %v770_v61 = vsel %vm768_vm15, %v769_v5, %v765_v54  ;;  %v841_v32 = vand.u32 31, %v839_v17  ;;  %vm176_vm0 = vweird.f32 %v1418_v6 }
  0xa8   :  { %v771_v49 = vadd.s32 %v770_v61, %v766_v36  ;;  %v1992_v0 = vand.u32 3, %v314_v1  ;;  %vm355_vm3 = vcmp.lt.s32.totalorder %v1431_v16, 0  ;;  %v185_v31 = vsel %vm178_vm14, %v181_v60, %v184_v53 }
  0xa9   :  { %v1996_v50 = vsub.s32 32, %v841_v32  ;;  %v327_v45 = vmul.f32 %v326_v48, %v1910_v29  ;;  %v2631_v44 = vand.u32 2147483647, %v1937_v4  ;;  %v320_v3 = vmul.f32 %v319_v20, %v1910_v29  ;;  %v986_v20 = vld [vmem:[%s2627_s1 + $0x3] sm:$0x1] }
  0xaa   :  { %v772_v55 = vadd.s32 536870912, %v771_v49  ;;  %vm2005_vm5 = vcmp.le.f32.partialorder %v353_v28, 0.7853982  ;;  %v474_v34 = vmul.f32 %v473_v47, %v471_v33  ;;  %v1341_v8 = vadd.s32 4294967294, %v613_v12 }
  0xab   :  { %v844_v2 = vshll.u32 %v1382_v35, %v841_v32  ;;  %v845_v46 = vshrl.u32 %v1383_v37, %v1996_v50  ;;  %v847_v30 = vshll.u32 %v1383_v37, %v841_v32  ;;  %v850_v51 = vshll.u32 %v1384_v39, %v841_v32 }
  0xac   :  { %v2010_v9 = vshrl.u32 %v772_v55, 30  ;;  %v848_v29 = vshrl.u32 %v1384_v39, %v1996_v50  ;;  %v851_v28 = vshrl.u32 %v1385_v41, %v1996_v50  ;;  %v853_v63 = vshll.u32 %v1385_v41, %v841_v32 }
  0xad   :  { %v854_v40 = vshrl.u32 %v1386_v43, %v1996_v50  ;;  %v328_v15 = vadd.f32 1.0, %v327_v45  ;;  %v834_v22 = vand.u32 8388607, %v2631_v44  ;;  %v2028_v10 = vshrl.u32 %v839_v17, 5 }
  0xae   :  { %v774_v27 = vshll.u32 %v2010_v9, 30  ;;  %v2032_v24 = vsel %vm176_vm0, nan, %v185_v31  ;;  %v475_v56 = vxor.u32 2147483648, %v474_v34  ;;  %v856_v54 = vshll.u32 %v1386_v43, %v841_v32 }
  0xaf   :  { %v857_v58 = vshrl.u32 %v1387_v52, %v1996_v50  ;;  %v477_v1 = vsub.s32 4, %v1784_v13  ;;  %vm1342_vm6 = vcmp.lt.s32.totalorder %v1341_v8, 0  ;;  %v2040_v36 = vor.u32 %v845_v46, %v844_v2 }
  0xb0   :  { %v2038_v42 = vsub.s32 %v771_v49, %v774_v27  ;;  %vm333_vm1 = vcmp.eq.s32.totalorder %v1992_v0, 0  ;;  %vm336_vm4 = vcmp.eq.s32.totalorder %v1992_v0, 2  ;;  %v2044_v6 = vor.u32 %v848_v29, %v847_v30 }
  0xb1   :  { %v2046_v60 = vor.u32 %v851_v28, %v850_v51  ;;  %v855_v53 = vor.u32 %v854_v40, %v853_v63  ;;  %v858_v5 = vor.u32 %v857_v58, %v856_v54  ;;  %v321_v48 = vadd.f32 1.0, %v320_v3 }
  0xb2   :  { %v329_v47 = vmul.f32 %v328_v15, %v1876_v62  ;;  %v835_v17 = vor.u32 8388608, %v834_v22  ;;  %vm859_vm7 = vcmp.lt.s32.totalorder %v2028_v10, 1  ;;  %v476_v33 = vsel %vm355_vm3, %v475_v56, %v474_v34 }
  0xb3   :  { %v2055_v12 = vsel %vm1342_vm6, 0, %v1341_v8  ;;  %vm861_vm8 = vcmp.lt.s32.totalorder %v2028_v10, 3  ;;  %vm862_vm9 = vcmp.lt.s32.totalorder %v2028_v10, 4  ;;  %vm776_vm10 = vcmp.lt.s32.totalorder %v2038_v42, 0 }
  0xb4   :  { %v777_v61 = vsub.s32 0, %v2038_v42  ;;  %vm860_vm11 = vcmp.lt.s32.totalorder %v2028_v10, 2  ;;  %v988_v62 = vmul.f32 3.1415927, %v986_v20  ;;  %v867_v32 = vsel %vm859_vm7, %v2040_v36, %v2044_v6 }
  0xb5   :  { %v868_v49 = vsel %vm862_vm9, %v855_v53, 920167782  ;;  %v871_v31 = vsel %vm859_vm7, %v2044_v6, %v2046_v60  ;;  %v872_v45 = vsel %vm862_vm9, %v858_v5, 1326507024  ;;  %v2077_v55 = vsel %vm2005_vm5, %v1431_v16, %v476_v33 }
  0xb6   :  { %v869_v3 = vsel %vm861_vm8, %v2046_v60, %v868_v49  ;;  %v2082_v34 = vshll.u32 %v835_v17, 8  ;;  %v2632_v8 = vstv %s2023_s28  ;;  %v334_v2 = vxor.u32 2147483648, %v329_v47 }
  0xb7   :  { %v337_v46 = vxor.u32 2147483648, %v321_v48  ;;  %v2088_v30 = vsel %vm355_vm3, %v477_v1, %v1784_v13  ;;  %v873_v51 = vsel %vm861_vm8, %v855_v53, %v872_v45  ;;  %v621_v29 = vsub.s32 4294967266, %v2055_v12 }
  0xb8   :  { %v778_v28 = vsel %vm776_vm10, %v777_v61, %v2038_v42  ;;  %v870_v63 = vsel %vm860_vm11, %v867_v32, %v869_v3  ;;  %v874_v40 = vsel %vm860_vm11, %v871_v31, %v873_v51  ;;  %v2102_v15 = vmul.f32 %v2077_v55, %v2077_v55 }
  0xb9   :  { %v601_v13 = vadd.s32 %v1829_v11, %v1827_v25  ;;  %v617_v27 = vsub.s32 32, %v2055_v12  ;;  %v2109_v22 = vsub.f32 %v988_v62, %v2632_v8  ;;  %v876_v56 = vand.u32 65535, %v2082_v34 }
  0xba   :  { %v877_v54 = vshrl.u32 %v2082_v34, 16  ;;  %v878_v58 = vand.u32 65535, %v874_v40  ;;  %v879_v1 = vshrl.u32 %v874_v40, 16  ;;  %v480_v53 = vsel %vm2005_vm5, 0, %v2088_v30 }
  0xbb   :  { %v779_v5 = vclz %v778_v28  ;;  %v900_v20 = vand.u32 65535, %v870_v63  ;;  %v901_v17 = vshrl.u32 %v870_v63, 16  ;;  %v2118_v25 = vsel %vm333_vm1, %v321_v48, %v334_v2 }
  0xbc   :  { %v2122_v11 = vsel %vm336_vm4, %v337_v46, %v329_v47  ;;  %v2125_v33 = vmul.f32 -0.001358992, %v2102_v15  ;;  %v622_v61 = vadd.s32 127, %v621_v29  ;;  %v489_v62 = vmul.f32 -0.00019511016, %v2102_v15 }
  0xbd   :  { %v618_v32 = vshll.u32 %v1953_v19, %v2055_v12  ;;  %v843_v49 = vshrl.u32 %v1382_v35, %v1996_v50  ;;  %v996_v31 = vand.u32 2139095040, %v2109_v22  ;;  %v619_v48 = vshrl.u32 %v601_v13, %v617_v27 }
  0xbe   :  { %v880_v45 = vmul.u32 %v878_v58, %v876_v56  ;;  %v881_v3 = vmul.u32 %v879_v1, %v876_v56  ;;  %v882_v2 = vmul.u32 %v878_v58, %v877_v54  ;;  %v1346_v47 = vadd.s32 4294967294, %v779_v5 }
  0xbf   :  { %v902_v46 = vmul.u32 %v900_v20, %v876_v56  ;;  %v903_v51 = vmul.u32 %v901_v17, %v876_v56  ;;  %v904_v28 = vmul.u32 %v900_v20, %v877_v54  ;;  %v623_v63 = vshll.u32 %v622_v61, 23 }
  0xc0   :  { %v883_v29 = vmul.u32 %v879_v1, %v877_v54  ;;  %v884_v40 = vshll.u32 %v881_v3, 16  ;;  %v886_v18 = vshll.u32 %v882_v2, 16  ;;  %vm332_vm12 = vcmp.lt.s32.totalorder %v1992_v0, 2 }
  0xc1   :  { %v863_v19 = vsel %vm859_vm7, %v843_v49, %v2040_v36  ;;  %v905_v50 = vmul.u32 %v901_v17, %v877_v54  ;;  %v906_v12 = vshll.u32 %v903_v51, 16  ;;  %v997_v13 = vshrl.u32 %v996_v31, 23 }
  0xc2   :  { %v864_v27 = vsel %vm862_vm9, %v2046_v60, 2102212464  ;;  %vm888_vm13 = vc.u32 %v880_v45, %v884_v40  ;;  %v890_v56 = vadd.s32 %v884_v40, %v880_v45  ;;  %v908_v58 = vshll.u32 %v904_v28, 16 }
  0xc3   :  { %vm1347_vm14 = vcmp.lt.s32.totalorder %v1346_v47, 0  ;;  %v885_v1 = vshrl.u32 %v881_v3, 16  ;;  %v889_v5 = vsel %vm888_vm13, 1, %v1388_v59  ;;  %vm910_vm15 = vc.u32 %v902_v46, %v906_v12 }
  0xc4   :  { %v891_v20 = vadd.s32 %v889_v5, %v883_v29  ;;  %vm892_vm2 = vc.u32 %v890_v56, %v886_v18  ;;  %v911_v61 = vsel %vm910_vm15, 1, %v1388_v59  ;;  %v912_v36 = vadd.s32 %v906_v12, %v902_v46 }
  0xc5   :  { %v865_v54 = vsel %vm861_vm8, %v2044_v6, %v864_v27  ;;  %v893_v17 = vsel %vm892_vm2, 1, %v1388_v59  ;;  %v913_v60 = vadd.s32 %v911_v61, %v905_v50  ;;  %v1353_v49 = vadd.s32 4294967169, %v997_v13 }
  0xc6   :  { %v887_v31 = vshrl.u32 %v882_v2, 16  ;;  %v895_v45 = vadd.s32 %v893_v17, %v891_v20  ;;  %v907_v40 = vshrl.u32 %v903_v51, 16  ;;  %vm914_vm0 = vc.u32 %v912_v36, %v908_v58 }
  0xc7   :  { %v490_v3 = vadd.f32 0.008332121, %v489_v62  ;;  %v782_v44 = vsel %vm1347_vm14, 0, %v1346_v47  ;;  %v915_v18 = vsel %vm914_vm0, 1, %v1388_v59  ;;  %v1003_v29 = vadd.s32 1, %v1353_v49 }
  0xc8   :  { %v620_v56 = vor.u32 %v619_v48, %v618_v32  ;;  %v896_v46 = vadd.s32 %v895_v45, %v885_v1  ;;  %v909_v12 = vshrl.u32 %v904_v28, 16  ;;  %v917_v5 = vadd.s32 %v915_v18, %v913_v60 }
  0xc9   :  { %v624_v8 = vor.u32 4788187, %v623_v63  ;;  %v866_v6 = vsel %vm860_vm11, %v863_v19, %v865_v54  ;;  %v2150_v50 = vadd.s32 %v912_v36, %v908_v58  ;;  %vm1004_vm3 = vcmp.gt.s32.totalorder %v1003_v29, 0 }
  0xca   :  { %v787_v2 = vsub.s32 4294967266, %v782_v44  ;;  %v2152_v51 = vadd.s32 %v896_v46, %v887_v31  ;;  %v918_v62 = vadd.s32 %v917_v5, %v907_v40  ;;  %v1005_v13 = vsel %vm1004_vm3, %v1003_v29, 0 }
  0xcb   :  { %v767_v47 = vadd.s32 %v1967_v23, %v1965_v26  ;;  %v783_v27 = vsub.s32 32, %v782_v44  ;;  %v2634_v32 = vand.u32 2147483647, %v2109_v22  ;;  %v1007_v48 = vand.u32 31, %v1005_v13 }
  0xcc   :  { %v2161_v10 = vsel %vm332_vm12, %v2118_v25, %v2122_v11  ;;  %v483_v28 = vadd.f32 0.041655596, %v2125_v33  ;;  %v491_v63 = vmul.f32 %v490_v3, %v2102_v15  ;;  %v919_v19 = vadd.s32 %v918_v62, %v909_v12 }
  0xcd   :  { %v627_v58 = vcvt.s32.f32 %v620_v56  ;;  %v920_v1 = vmul.u32 %v2082_v34, %v866_v6  ;;  %vm922_vm6 = vc.u32 %v2152_v51, %v2150_v50  ;;  %v2168_v26 = vsub.s32 32, %v1007_v48 }
  0xce   :  { %v625_v23 = vand.u32 2147483647, %v624_v8  ;;  %v784_v20 = vshll.u32 %v2038_v42, %v782_v44  ;;  %v788_v61 = vadd.s32 127, %v787_v2  ;;  %v923_v0 = vadd.s32 1, %v919_v19 }
  0xcf   :  { %v785_v25 = vshrl.u32 %v767_v47, %v783_v27  ;;  %v1000_v11 = vand.u32 8388607, %v2634_v32  ;;  %v1010_v33 = vshll.u32 %v1382_v35, %v1007_v48  ;;  %v1013_v36 = vshll.u32 %v1383_v37, %v1007_v48 }
  0xd0   :  { %v924_v54 = vsel %vm922_vm6, %v923_v0, %v919_v19  ;;  %v1016_v34 = vshll.u32 %v1384_v39, %v1007_v48  ;;  %v1019_v17 = vshll.u32 %v1385_v41, %v1007_v48  ;;  %v1020_v8 = vshrl.u32 %v1386_v43, %v2168_v26 }
  0xd1   :  { %v925_v60 = vadd.s32 %v924_v54, %v920_v1  ;;  %v1011_v44 = vshrl.u32 %v1383_v37, %v2168_v26  ;;  %v1014_v42 = vshrl.u32 %v1384_v39, %v2168_v26  ;;  %v1017_v49 = vshrl.u32 %v1385_v41, %v2168_v26 }
  0xd2   :  { %vm509_vm1 = vcmp.lt.s32.totalorder %v1660_v21, 0  ;;  %v789_v31 = vshll.u32 %v788_v61, 23  ;;  %v2186_v45 = vshrl.u32 %v1005_v13, 5  ;;  %v1022_v40 = vshll.u32 %v1386_v43, %v1007_v48 }
  0xd3   :  { %v484_v3 = vmul.f32 %v483_v28, %v2102_v15  ;;  %v492_v18 = vadd.f32 -0.16666654, %v491_v63  ;;  %v2641_v29 = vand.u32 2147483647, %v1660_v21  ;;  %v628_v46 = vmul.f32 %v627_v58, %v625_v23 }
  0xd4   :  { %v926_v12 = vadd.s32 536870912, %v925_v60  ;;  %v786_v5 = vor.u32 %v785_v25, %v784_v20  ;;  %v1001_v6 = vor.u32 8388608, %v1000_v11  ;;  %v1021_v2 = vor.u32 %v1020_v8, %v1019_v17  ;;  %v987_v11 = vld [vmem:[%s2627_s1 + $0x7] sm:$0x1]  ;;  %s2538_s1 = sld [smem:[#allocation2 + $0x80]] }
  0xd5   :  { %vm2192_vm4 = vcmp.le.f32.partialorder %v2641_v29, 0.7853982  ;;  %v1023_v62 = vshrl.u32 %v1387_v52, %v2168_v26  ;;  %v2200_v47 = vor.u32 %v1011_v44, %v1010_v33  ;;  %v2202_v27 = vor.u32 %v1014_v42, %v1013_v36 }
  0xd6   :  { %v2198_v13 = vshrl.u32 %v926_v12, 30  ;;  %v2204_v48 = vor.u32 %v1017_v49, %v1016_v34  ;;  %v790_v28 = vor.u32 4788187, %v789_v31  ;;  %vm1025_vm7 = vcmp.lt.s32.totalorder %v2186_v45, 1 }
  0xd7   :  { %v1024_v63 = vor.u32 %v1023_v62, %v1022_v40  ;;  %vm1028_vm8 = vcmp.lt.s32.totalorder %v2186_v45, 4  ;;  %v485_v19 = vadd.f32 -0.4999988, %v484_v3  ;;  %v629_v58 = vxor.u32 2147483648, %v628_v46 }
  0xd8   :  { %v928_v1 = vshll.u32 %v2198_v13, 30  ;;  %vm1027_vm9 = vcmp.lt.s32.totalorder %v2186_v45, 3  ;;  %v493_v23 = vmul.f32 %v492_v18, %v2102_v15  ;;  %v1034_v20 = vsel %vm1028_vm8, %v1021_v2, 920167782 }
  0xd9   :  { %v1038_v61 = vsel %vm1028_vm8, %v1024_v63, 1326507024  ;;  %v2215_v0 = vshll.u32 %v1001_v6, 8  ;;  %vm1026_vm10 = vcmp.lt.s32.totalorder %v2186_v45, 2  ;;  %v1033_v33 = vsel %vm1025_vm7, %v2200_v47, %v2202_v27 }
  0xda   :  { %v2217_v25 = vsub.s32 %v925_v60, %v928_v1  ;;  %v1037_v36 = vsel %vm1025_vm7, %v2202_v27, %v2204_v48  ;;  %v791_v54 = vand.u32 2147483647, %v790_v28  ;;  %v793_v34 = vcvt.s32.f32 %v786_v5 }
  0xdb   :  { %v1035_v17 = vsel %vm1027_vm9, %v2204_v48, %v1034_v20  ;;  %v1039_v8 = vsel %vm1027_vm9, %v1021_v2, %v1038_v61  ;;  %v486_v60 = vmul.f32 %v485_v19, %v2102_v15  ;;  %v630_v44 = vsel %vm509_vm1, %v629_v58, %v628_v46 }
  0xdc   :  { %vm930_vm11 = vcmp.lt.s32.totalorder %v2217_v25, 0  ;;  %v931_v42 = vsub.s32 0, %v2217_v25  ;;  %v989_v49 = vmul.f32 3.1415927, %v987_v11  ;;  %v1036_v31 = vsel %vm1026_vm10, %v1033_v33, %v1035_v17 }
  0xdd   :  { %v1040_v40 = vsel %vm1026_vm10, %v1037_v36, %v1039_v8  ;;  %v1042_v3 = vand.u32 65535, %v2215_v0  ;;  %v494_v18 = vadd.f32 1.0, %v493_v23  ;;  %v1043_v29 = vshrl.u32 %v2215_v0, 16 }
  0xde   :  { %v932_v15 = vsel %vm930_vm11, %v931_v42, %v2217_v25  ;;  %v1044_v46 = vand.u32 65535, %v1040_v40  ;;  %v2251_v12 = vsel %vm2192_vm4, %v1660_v21, %v630_v44  ;;  %v2253_v5 = vmul.f32 %v793_v34, %v791_v54 }
  0xdf   :  { %v933_v6 = vclz %v932_v15  ;;  %v1045_v2 = vshrl.u32 %v1040_v40, 16  ;;  %v2259_v62 = vand.u32 3, %v480_v53  ;;  %v1066_v63 = vand.u32 65535, %v1036_v31 }
  0xe0   :  { %v2261_v28 = vmul.u32 %v1044_v46, %v1043_v29  ;;  %v1067_v19 = vshrl.u32 %v1036_v31, 16  ;;  %v2263_v58 = vadd.f32 1.0, %v486_v60  ;;  %v2644_v23 = vstv %s2023_s28 }
  0xe1   :  { %v1349_v1 = vadd.s32 4294967294, %v933_v6  ;;  %v2267_v20 = vsub.f32 %v989_v49, %v2644_v23  ;;  %v1047_v61 = vmul.u32 %v1045_v2, %v1042_v3  ;;  %v2270_v11 = vmul.f32 %v494_v18, %v2077_v55 }
  0xe2   :  { %v2274_v38 = vmul.f32 %v2251_v12, %v2251_v12  ;;  %v1046_v30 = vmul.u32 %v1044_v46, %v1042_v3  ;;  %v1069_v53 = vmul.u32 %v1067_v19, %v1042_v3  ;;  %v795_v33 = vxor.u32 2147483648, %v2253_v5 }
  0xe3   :  { %v921_v36 = vadd.s32 %v2150_v50, %v2152_v51  ;;  %vm1350_vm5 = vcmp.lt.s32.totalorder %v1349_v1, 0  ;;  %v1050_v54 = vshll.u32 %v1047_v61, 16  ;;  %v1049_v17 = vmul.u32 %v1045_v2, %v1043_v29 }
  0xe4   :  { %v936_v34 = vsel %vm1350_vm5, 0, %v1349_v1  ;;  %v1052_v8 = vshll.u32 %v2261_v28, 16  ;;  %v1070_v60 = vmul.u32 %v1066_v63, %v1043_v29  ;;  %v1068_v42 = vmul.u32 %v1066_v63, %v1042_v3 }
  0xe5   :  { %v937_v55 = vsub.s32 32, %v936_v34  ;;  %v941_v44 = vsub.s32 4294967266, %v936_v34  ;;  %v1150_v49 = vand.u32 2139095040, %v2267_v20  ;;  %vm675_vm12 = vcmp.lt.s32.totalorder %v1749_v57, 0 }
  0xe6   :  { %v1051_v31 = vshrl.u32 %v1047_v61, 16  ;;  %vm1054_vm13 = vc.u32 %v1046_v30, %v1050_v54  ;;  %v1056_v40 = vadd.s32 %v1050_v54, %v1046_v30  ;;  %v1072_v18 = vshll.u32 %v1069_v53, 16 }
  0xe7   :  { %v938_v50 = vshll.u32 %v2217_v25, %v936_v34  ;;  %v939_v51 = vshrl.u32 %v921_v36, %v937_v55  ;;  %v942_v15 = vadd.s32 127, %v941_v44  ;;  %v1055_v46 = vsel %vm1054_vm13, 1, %v1388_v59 }
  0xe8   :  { %v1057_v6 = vadd.s32 %v1055_v46, %v1049_v17  ;;  %vm1058_vm14 = vc.u32 %v1056_v40, %v1052_v8  ;;  %v1071_v2 = vmul.u32 %v1067_v19, %v1043_v29  ;;  %v1074_v1 = vshll.u32 %v1070_v60, 16 }
  0xe9   :  { %v943_v23 = vshll.u32 %v942_v15, 23  ;;  %v1009_v3 = vshrl.u32 %v1382_v35, %v2168_v26  ;;  %v1059_v63 = vsel %vm1058_vm14, 1, %v1388_v59  ;;  %v1151_v61 = vshrl.u32 %v1150_v49, 23 }
  0xea   :  { %vm330_vm15 = vweird.f32 %v1420_v7  ;;  %vm502_vm2 = vcmp.eq.s32.totalorder %v2259_v62, 2  ;;  %v1030_v25 = vsel %vm1028_vm8, %v2204_v48, 2102212464  ;;  %v1061_v30 = vadd.s32 %v1059_v63, %v1057_v6 }
  0xeb   :  { %vm1076_vm0 = vc.u32 %v1068_v42, %v1072_v18  ;;  %v1078_v36 = vadd.s32 %v1072_v18, %v1068_v42  ;;  %vm499_vm3 = vcmp.eq.s32.totalorder %v2259_v62, 0  ;;  %v940_v29 = vor.u32 %v939_v51, %v938_v50 }
  0xec   :  { %v1053_v19 = vshrl.u32 %v2261_v28, 16  ;;  %v1073_v26 = vshrl.u32 %v1069_v53, 16  ;;  %v1077_v54 = vsel %vm1076_vm0, 1, %v1388_v59  ;;  %v944_v34 = vor.u32 4788187, %v943_v23 }
  0xed   :  { %v1062_v17 = vadd.s32 %v1061_v30, %v1051_v31  ;;  %v1079_v8 = vadd.s32 %v1077_v54, %v1071_v2  ;;  %vm1080_vm6 = vc.u32 %v1078_v36, %v1074_v1  ;;  %v1029_v55 = vsel %vm1025_vm7, %v1009_v3, %v2200_v47 }
  0xee   :  { %v1031_v48 = vsel %vm1027_vm9, %v2202_v27, %v1030_v25  ;;  %v1081_v44 = vsel %vm1080_vm6, 1, %v1388_v59  ;;  %v1356_v42 = vadd.s32 4294967169, %v1151_v61  ;;  %v631_v28 = vsub.s32 4, %v1930_v14 }
  0xef   :  { %v2645_v53 = vand.u32 2147483647, %v1749_v57  ;;  %v1075_v31 = vshrl.u32 %v1070_v60, 16  ;;  %v1083_v40 = vadd.s32 %v1081_v44, %v1079_v8  ;;  %v643_v18 = vmul.f32 -0.00019511016, %v2274_v38 }
  0xf0   :  { %v2310_v47 = vadd.s32 %v1062_v17, %v1053_v19  ;;  %v2312_v50 = vadd.s32 %v1078_v36, %v1074_v1  ;;  %v1157_v27 = vadd.s32 1, %v1356_v42  ;;  %v945_v51 = vand.u32 2147483647, %v944_v34 }
  0xf1   :  { %vm2305_vm8 = vcmp.le.f32.partialorder %v2645_v53, 0.7853982  ;;  %v947_v15 = vcvt.s32.f32 %v940_v29  ;;  %v1032_v46 = vsel %vm1026_vm10, %v1029_v55, %v1031_v48  ;;  %v1084_v6 = vadd.s32 %v1083_v40, %v1073_v26 }
  0xf2   :  { %v500_v2 = vxor.u32 2147483648, %v2270_v11  ;;  %v503_v23 = vxor.u32 2147483648, %v2263_v58  ;;  %v796_v60 = vsel %vm675_vm12, %v795_v33, %v2253_v5  ;;  %vm1158_vm7 = vcmp.gt.s32.totalorder %v1157_v27, 0 }
  0xf3   :  { %v2326_v1 = vsel %vm509_vm1, %v631_v28, %v1930_v14  ;;  %v636_v45 = vmul.f32 -0.001358992, %v2274_v38  ;;  %v1085_v3 = vadd.s32 %v1084_v6, %v1075_v31  ;;  %v1159_v63 = vsel %vm1158_vm7, %v1157_v27, 0 }
  0xf4   :  { %v644_v61 = vadd.f32 0.008332121, %v643_v18  ;;  %v1086_v25 = vmul.u32 %v2215_v0, %v1032_v46  ;;  %vm1088_vm9 = vc.u32 %v2310_v47, %v2312_v50  ;;  %v1161_v30 = vand.u32 31, %v1159_v63 }
  0xf5   :  { %v2335_v5 = vsel %vm2305_vm8, %v1749_v57, %v796_v60  ;;  %v948_v33 = vmul.f32 %v947_v15, %v945_v51  ;;  %v1089_v36 = vadd.s32 1, %v1085_v3  ;;  %v2633_v14 = vand.u32 2147483647, %v2267_v20 }
  0xf6   :  { %v2341_v29 = vsel %vm330_vm15, nan, %v2161_v10  ;;  %vm498_vm1 = vcmp.lt.s32.totalorder %v2259_v62, 2  ;;  %v504_v0 = vsel %vm502_vm2, %v503_v23, %v2270_v11  ;;  %v634_v19 = vsel %vm2192_vm4, 0, %v2326_v1 }
  0xf7   :  { %v501_v26 = vsel %vm499_vm3, %v2263_v58, %v500_v2  ;;  %vm829_vm10 = vcmp.lt.s32.totalorder %v1937_v4, 0  ;;  %v1090_v54 = vsel %vm1088_vm9, %v1089_v36, %v1085_v3  ;;  %v2354_v7 = vsub.s32 32, %v1161_v30 }
  0xf8   :  { %v637_v10 = vadd.f32 0.041655596, %v636_v45  ;;  %v645_v34 = vmul.f32 %v644_v61, %v2274_v38  ;;  %v2359_v17 = vmul.f32 %v2335_v5, %v2335_v5  ;;  %v1091_v11 = vadd.s32 %v1090_v54, %v1086_v25 }
  0xf9   :  { %v949_v8 = vxor.u32 2147483648, %v948_v33  ;;  %v1154_v56 = vand.u32 8388607, %v2633_v14  ;;  %v2363_v55 = vshrl.u32 %v1159_v63, 5  ;;  %v1173_v58 = vshll.u32 %v1385_v41, %v1161_v30 }
  0xfa   :  { %v1092_v48 = vadd.s32 536870912, %v1091_v11  ;;  %v1167_v44 = vshll.u32 %v1383_v37, %v1161_v30  ;;  %v1170_v42 = vshll.u32 %v1384_v39, %v1161_v30  ;;  %v1176_v28 = vshll.u32 %v1386_v43, %v1161_v30 }
  0xfb   :  { %v1168_v53 = vshrl.u32 %v1384_v39, %v2354_v7  ;;  %v1171_v31 = vshrl.u32 %v1385_v41, %v2354_v7  ;;  %v1174_v40 = vshrl.u32 %v1386_v43, %v2354_v7  ;;  %v1177_v18 = vshrl.u32 %v1387_v52, %v2354_v7 }
  0xfc   :  { %v2379_v27 = vsel %vm498_vm1, %v501_v26, %v504_v0  ;;  %v2381_v51 = vshrl.u32 %v1092_v48, 30  ;;  %v1164_v15 = vshll.u32 %v1382_v35, %v1161_v30  ;;  %v1165_v39 = vshrl.u32 %v1383_v37, %v2354_v7 }
  0xfd   :  { %v638_v46 = vmul.f32 %v637_v10, %v2274_v38  ;;  %v809_v41 = vmul.f32 -0.00019511016, %v2359_v17  ;;  %v2648_v43 = vand.u32 2147483647, %v1937_v4  ;;  %v1175_v52 = vor.u32 %v1174_v40, %v1173_v58 }
  0xfe   :  { %v646_v62 = vadd.f32 -0.16666654, %v645_v34  ;;  %v950_v2 = vsel %vm829_vm10, %v949_v8, %v948_v33  ;;  %v1094_v23 = vshll.u32 %v2381_v51, 30  ;;  %v1155_v60 = vor.u32 8388608, %v1154_v56 }
  0xff   :  { %vm2390_vm4 = vcmp.le.f32.partialorder %v2648_v43, 0.7853982  ;;  %v2397_v1 = vor.u32 %v1168_v53, %v1167_v44  ;;  %v2399_v37 = vor.u32 %v1171_v31, %v1170_v42  ;;  %v1178_v45 = vor.u32 %v1177_v18, %v1176_v28 }
 0x100   :  { %vm1182_vm11 = vcmp.lt.s32.totalorder %v2363_v55, 4  ;;  %v802_v3 = vmul.f32 -0.001358992, %v2359_v17  ;;  %v1095_v63 = vsub.s32 %v1091_v11, %v1094_v23  ;;  %v2403_v61 = vor.u32 %v1165_v39, %v1164_v15 }
 0x101   :  { %vm1179_vm5 = vcmp.lt.s32.totalorder %v2363_v55, 1  ;;  %v810_v25 = vadd.f32 0.008332121, %v809_v41  ;;  %v2409_v30 = vsel %vm2390_vm4, %v1937_v4, %v950_v2  ;;  %vm1181_vm13 = vcmp.lt.s32.totalorder %v2363_v55, 3 }
 0x102   :  { %v1188_v33 = vsel %vm1182_vm11, %v1175_v52, 920167782  ;;  %v639_v36 = vadd.f32 -0.4999988, %v638_v46  ;;  %vm1096_vm14 = vcmp.lt.s32.totalorder %v1095_v63, 0  ;;  %v1097_v0 = vsub.s32 0, %v1095_v63 }
 0x103   :  { %v2414_v26 = vshll.u32 %v1155_v60, 8  ;;  %v647_v54 = vmul.f32 %v646_v62, %v2274_v38  ;;  %vm1180_vm15 = vcmp.lt.s32.totalorder %v2363_v55, 2  ;;  %v1191_v10 = vsel %vm1179_vm5, %v2397_v1, %v2399_v37 }
 0x104   :  { %v1192_v34 = vsel %vm1182_vm11, %v1178_v45, 1326507024  ;;  %v2426_v11 = vmul.f32 %v2409_v30, %v2409_v30  ;;  %v1098_v8 = vsel %vm1096_vm14, %v1097_v0, %v1095_v63  ;;  %v1187_v56 = vsel %vm1179_vm5, %v2403_v61, %v2397_v1 }
 0x105   :  { %v1189_v58 = vsel %vm1181_vm13, %v2399_v37, %v1188_v33  ;;  %v803_v48 = vadd.f32 0.041655596, %v802_v3  ;;  %v811_v44 = vmul.f32 %v810_v25, %v2359_v17  ;;  %v1099_v42 = vclz %v1098_v8 }
 0x106   :  { %v1193_v28 = vsel %vm1181_vm13, %v1175_v52, %v1192_v34  ;;  %v2438_v53 = vand.u32 3, %v634_v19  ;;  %v1196_v18 = vand.u32 65535, %v2414_v26  ;;  %v1190_v39 = vsel %vm1180_vm15, %v1187_v56, %v1189_v58 }
 0x107   :  { %v1194_v40 = vsel %vm1180_vm15, %v1191_v10, %v1193_v28  ;;  %v1354_v15 = vadd.s32 4294967294, %v1099_v42  ;;  %v2447_v43 = vmul.f32 %v639_v36, %v2274_v38  ;;  %v2449_v62 = vadd.f32 1.0, %v647_v54 }
 0x108   :  { %v1198_v46 = vand.u32 65535, %v1194_v40  ;;  %v1199_v41 = vshrl.u32 %v1194_v40, 16  ;;  %v963_v19 = vmul.f32 -0.00019511016, %v2426_v11  ;;  %v1197_v52 = vshrl.u32 %v2414_v26, 16 }
 0x109   :  { %v2454_v2 = vmul.f32 %v803_v48, %v2359_v17  ;;  %v2456_v23 = vadd.f32 -0.16666654, %v811_v44  ;;  %v1087_v60 = vadd.s32 %v2312_v50, %v2310_v47  ;;  %vm1355_vm2 = vcmp.lt.s32.totalorder %v1354_v15, 0 }
 0x10a   :  { %v1102_v45 = vsel %vm1355_vm2, 0, %v1354_v15  ;;  %v1201_v3 = vmul.u32 %v1199_v41, %v1196_v18  ;;  %v1220_v25 = vand.u32 65535, %v1190_v39  ;;  %v1221_v38 = vshrl.u32 %v1190_v39, 16 }
 0x10b   :  { %v1103_v33 = vsub.s32 32, %v1102_v45  ;;  %v1104_v36 = vshll.u32 %v1095_v63, %v1102_v45  ;;  %v1107_v0 = vsub.s32 4294967266, %v1102_v45  ;;  %v1200_v54 = vmul.u32 %v1198_v46, %v1196_v18 }
 0x10c   :  { %v956_v10 = vmul.f32 -0.001358992, %v2426_v11  ;;  %v964_v34 = vadd.f32 0.008332121, %v963_v19  ;;  %v1163_v8 = vshrl.u32 %v1382_v35, %v2354_v7  ;;  %v1202_v56 = vmul.u32 %v1198_v46, %v1197_v52 }
 0x10d   :  { %v1105_v58 = vshrl.u32 %v1087_v60, %v1103_v33  ;;  %v1108_v48 = vadd.s32 127, %v1107_v0  ;;  %v1203_v44 = vmul.u32 %v1199_v41, %v1197_v52  ;;  %v1204_v47 = vshll.u32 %v1201_v3, 16 }
 0x10e   :  { %v1206_v50 = vshll.u32 %v1202_v56, 16  ;;  %v1222_v42 = vmul.u32 %v1220_v25, %v1196_v18  ;;  %v1223_v28 = vmul.u32 %v1221_v38, %v1196_v18  ;;  %v1224_v40 = vmul.u32 %v1220_v25, %v1197_v52 }
 0x10f   :  { %v1106_v15 = vor.u32 %v1105_v58, %v1104_v36  ;;  %v1109_v39 = vshll.u32 %v1108_v48, 23  ;;  %vm1208_vm0 = vc.u32 %v1200_v54, %v1204_v47  ;;  %v1210_v63 = vadd.s32 %v1204_v47, %v1200_v54 }
 0x110   :  { %v1205_v45 = vshrl.u32 %v1201_v3, 16  ;;  %v1209_v14 = vsel %vm1208_vm0, 1, %v1388_v59  ;;  %v1225_v19 = vmul.u32 %v1221_v38, %v1197_v52  ;;  %v1226_v31 = vshll.u32 %v1223_v28, 16 }
 0x111   :  { %v1110_v32 = vor.u32 4788187, %v1109_v39  ;;  %v1113_v35 = vcvt.s32.f32 %v1106_v15  ;;  %v1211_v7 = vadd.s32 %v1209_v14, %v1203_v44  ;;  %vm1212_vm3 = vc.u32 %v1210_v63, %v1206_v50 }
 0x112   :  { %v1184_v46 = vsel %vm1182_vm11, %v2399_v37, 2102212464  ;;  %v1213_v18 = vsel %vm1212_vm3, 1, %v1388_v59  ;;  %v1228_v41 = vshll.u32 %v1224_v40, 16  ;;  %vm1230_vm6 = vc.u32 %v1222_v42, %v1226_v31 }
 0x113   :  { %v1111_v60 = vand.u32 2147483647, %v1110_v32  ;;  %v1215_v25 = vadd.s32 %v1213_v18, %v1211_v7  ;;  %v1231_v3 = vsel %vm1230_vm6, 1, %v1388_v59  ;;  %v1232_v33 = vadd.s32 %v1226_v31, %v1222_v42 }
 0x114   :  { %v957_v36 = vadd.f32 0.041655596, %v956_v10  ;;  %v965_v52 = vmul.f32 %v964_v34, %v2426_v11  ;;  %v1207_v38 = vshrl.u32 %v1202_v56, 16  ;;  %v1233_v0 = vadd.s32 %v1231_v3, %v1225_v19 }
 0x115   :  { %v1114_v14 = vmul.f32 %v1113_v35, %v1111_v60  ;;  %v1216_v54 = vadd.s32 %v1215_v25, %v1205_v45  ;;  %v1227_v58 = vshrl.u32 %v1223_v28, 16  ;;  %vm1234_vm7 = vc.u32 %v1232_v33, %v1228_v41 }
 0x116   :  { %vm995_vm9 = vcmp.lt.s32.totalorder %v2109_v22, 0  ;;  %v1183_v37 = vsel %vm1179_vm5, %v1163_v8, %v2403_v61  ;;  %v1185_v32 = vsel %vm1181_vm13, %v2397_v1, %v1184_v46  ;;  %v1235_v31 = vsel %vm1234_vm7, 1, %v1388_v59 }
 0x117   :  { %vm653_vm1 = vcmp.eq.s32.totalorder %v2438_v53, 0  ;;  %v2651_v10 = vand.u32 2147483647, %v2109_v22  ;;  %v1115_v56 = vxor.u32 2147483648, %v1114_v14  ;;  %v1229_v48 = vshrl.u32 %v1224_v40, 16 }
 0x118   :  { %v1237_v44 = vadd.s32 %v1235_v31, %v1233_v0  ;;  %v2654_v61 = vsub.s32 4, %v2010_v9  ;;  %v958_v1 = vmul.f32 %v957_v36, %v2426_v11  ;;  %v2491_v59 = vadd.s32 %v1216_v54, %v1207_v38 }
 0x119   :  { %vm2481_vm11 = vcmp.le.f32.partialorder %v2651_v10, 0.7853982  ;;  %v2493_v47 = vadd.s32 %v1232_v33, %v1228_v41  ;;  %vm496_vm5 = vweird.f32 %v1431_v16  ;;  %v966_v50 = vadd.f32 -0.16666654, %v965_v52 }
 0x11a   :  { %v798_v8 = vsel %vm675_vm12, %v2654_v61, %v2010_v9  ;;  %v1116_v42 = vsel %vm995_vm9, %v1115_v56, %v1114_v14  ;;  %v1186_v28 = vsel %vm1180_vm15, %v1183_v37, %v1185_v32  ;;  %v1238_v40 = vadd.s32 %v1237_v44, %v1227_v58 }
 0x11b   :  { %v641_v15 = vadd.f32 1.0, %v2447_v43  ;;  %v649_v9 = vmul.f32 %v2449_v62, %v2251_v12  ;;  %v805_v39 = vadd.f32 -0.4999988, %v2454_v2  ;;  %v2507_v63 = vsel %vm2481_vm11, %v2109_v22, %v1116_v42 }
 0x11c   :  { %vm652_vm12 = vcmp.lt.s32.totalorder %v2438_v53, 2  ;;  %v813_v45 = vmul.f32 %v2456_v23, %v2359_v17  ;;  %v951_v55 = vsub.s32 4, %v2198_v13  ;;  %v1121_v43 = vmul.f32 %v2507_v63, %v2507_v63 }
 0x11d   :  { %v1239_v19 = vadd.s32 %v1238_v40, %v1229_v48  ;;  %v959_v35 = vadd.f32 -0.4999988, %v958_v1  ;;  %v1117_v12 = vsub.s32 4, %v2381_v51  ;;  %v1240_v62 = vmul.u32 %v2414_v26, %v1186_v28 }
 0x11e   :  { %vm1242_vm13 = vc.u32 %v2491_v59, %v2493_v47  ;;  %v967_v2 = vmul.f32 %v966_v50, %v2426_v11  ;;  %v1122_v7 = vmul.f32 -0.001358992, %v1121_v43  ;;  %v1129_v46 = vmul.f32 -0.00019511016, %v1121_v43 }
 0x11f   :  { %v1243_v18 = vadd.s32 1, %v1239_v19  ;;  %v654_v23 = vxor.u32 2147483648, %v649_v9  ;;  %vm656_vm14 = vcmp.eq.s32.totalorder %v2438_v53, 2  ;;  %v657_v41 = vxor.u32 2147483648, %v641_v15 }
 0x120   :  { %v806_v60 = vmul.f32 %v805_v39, %v2359_v17  ;;  %v814_v25 = vadd.f32 1.0, %v813_v45  ;;  %v1123_v3 = vadd.f32 0.041655596, %v1122_v7  ;;  %v1130_v33 = vadd.f32 0.008332121, %v1129_v46 }
 0x121   :  { %v1244_v36 = vsel %vm1242_vm13, %v1243_v18, %v1239_v19  ;;  %v800_v26 = vsel %vm2305_vm8, 0, %v798_v8  ;;  %v952_v52 = vsel %vm829_vm10, %v951_v55, %v2198_v13  ;;  %v960_v38 = vmul.f32 %v959_v35, %v2426_v11 }
 0x122   :  { %v1245_v0 = vadd.s32 %v1244_v36, %v1240_v62  ;;  %v968_v14 = vadd.f32 1.0, %v967_v2  ;;  %v1118_v54 = vsel %vm995_vm9, %v1117_v12, %v2381_v51  ;;  %v1124_v17 = vmul.f32 %v1123_v3, %v1121_v43 }
 0x123   :  { %v1131_v58 = vmul.f32 %v1130_v33, %v1121_v43  ;;  %v655_v37 = vsel %vm653_vm1, %v641_v15, %v654_v23  ;;  %v658_v49 = vsel %vm656_vm14, %v657_v41, %v649_v9  ;;  %v807_v32 = vadd.f32 1.0, %v806_v60 }
 0x124   :  { %v1246_v31 = vadd.s32 536870912, %v1245_v0  ;;  %v815_v13 = vmul.f32 %v814_v25, %v2335_v5  ;;  %v954_v11 = vsel %vm2390_vm4, 0, %v952_v52  ;;  %v1125_v10 = vadd.f32 -0.4999988, %v1124_v17 }
 0x125   :  { %v1132_v56 = vadd.f32 -0.16666654, %v1131_v58  ;;  %v506_v51 = vsel %vm496_vm5, nan, %v2379_v27  ;;  %v817_v48 = vand.u32 3, %v800_v26  ;;  %v1120_v44 = vsel %vm2481_vm11, 0, %v1118_v54 }
 0x126   :  { %v2545_v61 = vshrl.u32 %v1246_v31, 30  ;;  %v961_v8 = vadd.f32 1.0, %v960_v38  ;;  %v969_v5 = vmul.f32 %v968_v14, %v2409_v30  ;;  %v1126_v1 = vmul.f32 %v1125_v10, %v1121_v43 }
 0x127   :  { %v1133_v6 = vmul.f32 %v1132_v56, %v1121_v43  ;;  %vm650_vm8 = vweird.f32 %v1660_v21  ;;  %v659_v50 = vsel %vm652_vm12, %v655_v37, %v658_v49  ;;  %v971_v42 = vand.u32 3, %v954_v11 }
 0x128   :  { %v1248_v16 = vshll.u32 %v2545_v61, 30  ;;  %v820_v27 = vxor.u32 2147483648, %v815_v13  ;;  %v823_v28 = vxor.u32 2147483648, %v807_v32  ;;  %v1127_v40 = vadd.f32 1.0, %v1126_v1 }
 0x129   :  { %v1134_v34 = vadd.f32 1.0, %v1133_v6  ;;  %vm819_vm10 = vcmp.eq.s32.totalorder %v817_v48, 0  ;;  %vm822_vm4 = vcmp.eq.s32.totalorder %v817_v48, 2  ;;  %v1137_v15 = vand.u32 3, %v1120_v44 }
 0x12a   :  { %v1249_v9 = vsub.s32 %v1245_v0, %v1248_v16  ;;  %vm818_vm15 = vcmp.lt.s32.totalorder %v817_v48, 2  ;;  %v974_v30 = vxor.u32 2147483648, %v969_v5  ;;  %v977_v39 = vxor.u32 2147483648, %v961_v8 }
 0x12b   :  { %v1135_v53 = vmul.f32 %v1134_v34, %v2507_v63  ;;  %vm973_vm2 = vcmp.eq.s32.totalorder %v971_v42, 0  ;;  %vm976_vm0 = vcmp.eq.s32.totalorder %v971_v42, 2  ;;  %v821_v55 = vsel %vm819_vm10, %v807_v32, %v820_v27 }
 0x12c   :  { %vm1250_vm3 = vcmp.lt.s32.totalorder %v1249_v9, 0  ;;  %v1251_v45 = vsub.s32 0, %v1249_v9  ;;  %v824_v43 = vsel %vm822_vm4, %v823_v28, %v815_v13  ;;  %v1143_v35 = vxor.u32 2147483648, %v1127_v40 }
 0x12d   :  { %v1140_v19 = vxor.u32 2147483648, %v1135_v53  ;;  %v661_v12 = vstv %s2538_s1  ;;  %vm1139_vm6 = vcmp.eq.s32.totalorder %v1137_v15, 0  ;;  %vm1142_vm7 = vcmp.eq.s32.totalorder %v1137_v15, 2 }
 0x12e   :  { %v1252_v62 = vsel %vm1250_vm3, %v1251_v45, %v1249_v9  ;;  %vm972_vm9 = vcmp.lt.s32.totalorder %v971_v42, 2  ;;  %v975_v2 = vsel %vm973_vm2, %v961_v8, %v974_v30  ;;  %v978_v7 = vsel %vm976_vm0, %v977_v39, %v969_v5 }
 0x12f   :  { %v1253_v46 = vclz %v1252_v62  ;;  %v2655_v63 = vstv %s1969_s27  ;;  %v660_v23 = vsel %vm650_vm8, nan, %v659_v50  ;;  %vm816_vm1 = vweird.f32 %v1749_v57 }
 0x130   :  { %v342_v18 = vmul.f32 %v2655_v63, %v2032_v24  ;;  %v825_v41 = vsel %vm818_vm15, %v821_v55, %v824_v43  ;;  %vm1138_vm11 = vcmp.lt.s32.totalorder %v1137_v15, 2  ;;  %v1141_v60 = vsel %vm1139_vm6, %v1127_v40, %v1140_v19 }
 0x131   :  { %v1144_v25 = vsel %vm1142_vm7, %v1143_v35, %v1135_v53  ;;  %v1357_v3 = vadd.s32 4294967294, %v1253_v46  ;;  %v2656_v33 = vmov %v2655_v63  ;;  %v662_v26 = vmul.f32 %v661_v12, %v506_v51 }
 0x132   :  { %v343_v36 = vmul.f32 %v2656_v33, %v2341_v29  ;;  %vm970_vm5 = vweird.f32 %v1937_v4  ;;  %v979_v24 = vsel %vm972_vm9, %v975_v2, %v978_v7  ;;  %v826_v21 = vsel %vm816_vm1, nan, %v825_v41 }
 0x133   :  { %v981_v52 = vstv %s2552_s5  ;;  %v1241_v57 = vadd.s32 %v2493_v47, %v2491_v59  ;;  %vm1358_vm12 = vcmp.lt.s32.totalorder %v1357_v3, 0  ;;  %v2573_v38 = vmul.f32 %v661_v12, %v660_v23 }
 0x134   :  { %vm1136_vm13 = vweird.f32 %v2109_v22  ;;  %v1145_v0 = vsel %vm1138_vm11, %v1141_v60, %v1144_v25  ;;  %v1256_v14 = vsel %vm1358_vm12, 0, %v1357_v3  ;;  %v980_v54 = vsel %vm970_vm5, nan, %v979_v24 }
 0x135   :  { %v1257_v29 = vsub.s32 32, %v1256_v14  ;;  %v1258_v17 = vshll.u32 %v1249_v9, %v1256_v14  ;;  %v1261_v58 = vsub.s32 4294967266, %v1256_v14  ;;  %v982_v4 = vmul.f32 %v981_v52, %v826_v21 }
 0x136   :  { %v1146_v37 = vsel %vm1136_vm13, nan, %v1145_v0  ;;  %v983_v31 = vmul.f32 %v981_v52, %v980_v54  ;;  %v1304_v13 = vmul.f32 %v662_v26, %v342_v18  ;;  %v1305_v59 = vmul.f32 %v2573_v38, %v343_v36 }
 0x137   :  { %v1259_v49 = vshrl.u32 %v1241_v57, %v1257_v29  ;;  %v1262_v32 = vadd.s32 127, %v1261_v58  ;;  %v1301_v10 = vstv %s2563_s6  ;;  %vm1306_vm14 = vcmask 516096  }
 0x138   :  { %v1302_v56 = vmul.f32 %v1301_v10, %v1146_v37  ;;  %v1309_v22 = vmul.f32 %v1304_v13, %v982_v4  ;;  %1307 = vst.msk [vmem:[%s2628_s2 + $0x1] sm:$0x1] %vm1306_vm14, %v1304_v13  ;;  %v1317_v44 = vmul.f32 %v982_v4, %v662_v26  ;;  %v1310_v8 = vmul.f32 %v1305_v59, %v983_v31 }
 0x139   :  { %v1260_v47 = vor.u32 %v1259_v49, %v1258_v17  ;;  %v1263_v11 = vshll.u32 %v1262_v32, 23  ;;  %1308 = vst.msk [vmem:[%s2628_s2 + $0x5] sm:$0x1] %vm1306_vm14, %v1305_v59  ;;  %vm1149_vm8 = vcmp.lt.s32.totalorder %v2267_v20, 0  ;;  %v2657_v42 = vand.u32 2147483647, %v2267_v20 }
 0x13a   :  { %v1313_v5 = vmul.f32 %v1309_v22, %v1302_v56  ;;  %1311 = vst.msk [vmem:[%s2628_s2 + $0x2] sm:$0x1] %vm1306_vm14, %v1309_v22  ;;  %v1319_v6 = vmul.f32 %v1317_v44, %v1302_v56  ;;  %v1271_v40 = vsub.s32 4, %v2545_v61  ;;  %vm1290_vm0 = vweird.f32 %v2267_v20 }
 0x13b   :  { %v1264_v51 = vor.u32 4788187, %v1263_v11  ;;  %v1267_v48 = vcvt.s32.f32 %v1260_v47  ;;  %1312 = vst.msk [vmem:[%s2628_s2 + $0x6] sm:$0x1] %vm1306_vm14, %v1310_v8  ;;  %vm2605_vm10 = vcmp.le.f32.partialorder %v2657_v42, 0.7853982  ;;  %v1318_v3 = vmul.f32 %v983_v31, %v2573_v38 }
 0x13c   :  { %1315 = vst.msk [vmem:[%s2628_s2 + $0x3] sm:$0x1] %vm1306_vm14, %v1313_v5  ;;  %v1272_v39 = vsel %vm1149_vm8, %v1271_v40, %v2545_v61 }
 0x13d   :  { %v1265_v1 = vand.u32 2147483647, %v1264_v51  ;;  %1321 = vst.msk [vmem:[%s2628_s2] sm:$0x1] %vm1306_vm14, %v1319_v6  ;;  %v1274_v55 = vsel %vm2605_vm10, 0, %v1272_v39 }
 0x13e   :  { %v1291_v62 = vand.u32 3, %v1274_v55 }
 0x13f   :  { %v1268_v50 = vmul.f32 %v1267_v48, %v1265_v1 }
 0x140   :  { %vm1296_vm4 = vcmp.eq.s32.totalorder %v1291_v62, 2  ;;  %vm1293_vm15 = vcmp.eq.s32.totalorder %v1291_v62, 0  ;;  %vm1292_vm2 = vcmp.lt.s32.totalorder %v1291_v62, 2 }
 0x141   :  { %v1269_v27 = vxor.u32 2147483648, %v1268_v50 }
 0x143   :  { %v1270_v28 = vsel %vm1149_vm8, %v1269_v27, %v1268_v50 }
 0x144   :  { %v1273_v34 = vsel %vm2605_vm10, %v2267_v20, %v1270_v28 }
 0x145   :  { %v1275_v15 = vmul.f32 %v1273_v34, %v1273_v34 }
 0x147   :  { %v1276_v9 = vmul.f32 -0.001358992, %v1275_v15  ;;  %v1283_v30 = vmul.f32 -0.00019511016, %v1275_v15 }
 0x149   :  { %v1277_v53 = vadd.f32 0.041655596, %v1276_v9  ;;  %v1284_v45 = vadd.f32 0.008332121, %v1283_v30 }
 0x14b   :  { %v1278_v43 = vmul.f32 %v1277_v53, %v1275_v15  ;;  %v1285_v19 = vmul.f32 %v1284_v45, %v1275_v15 }
 0x14d   :  { %v1279_v35 = vadd.f32 -0.4999988, %v1278_v43  ;;  %v1286_v12 = vadd.f32 -0.16666654, %v1285_v19 }
 0x14f   :  { %v1280_v2 = vmul.f32 %v1279_v35, %v1275_v15  ;;  %v1287_v7 = vmul.f32 %v1286_v12, %v1275_v15 }
 0x151   :  { %v1281_v46 = vadd.f32 1.0, %v1280_v2  ;;  %v1288_v63 = vadd.f32 1.0, %v1287_v7 }
 0x153   :  { %v1289_v18 = vmul.f32 %v1288_v63, %v1273_v34  ;;  %v1297_v23 = vxor.u32 2147483648, %v1281_v46 }
 0x155   :  { %v1294_v61 = vxor.u32 2147483648, %v1289_v18  ;;  %v1298_v41 = vsel %vm1296_vm4, %v1297_v23, %v1289_v18 }
 0x157   :  { %v1295_v60 = vsel %vm1293_vm15, %v1281_v46, %v1294_v61 }
 0x158   :  { %v1299_v25 = vsel %vm1292_vm2, %v1295_v60, %v1298_v41 }
 0x159   :  { %v1300_v33 = vsel %vm1290_vm0, nan, %v1299_v25 }
 0x15a   :  { %v1303_v36 = vmul.f32 %v1301_v10, %v1300_v33 }
 0x15c   :  { %v1314_v26 = vmul.f32 %v1310_v8, %v1303_v36  ;;  %v1320_v24 = vmul.f32 %v1318_v3, %v1303_v36 }
 0x15e   :  { %1316 = vst.msk [vmem:[%s2628_s2 + $0x7] sm:$0x1] %vm1306_vm14, %v1314_v26 }
 0x15f   :  { %1322 = vst.msk [vmem:[%s2628_s2 + $0x4] sm:$0x1] %vm1306_vm14, %v1320_v24 }
 0x160   :  { %1327 = vsyncpa [#allocation3], 1 }

</bundles_post_ra>
